<compile_context>
chip_gen: v6e
topology: v6e:2x2x1
jax: 0.10.0
libtpu: 0.0.40
codegen_flags: <defaults>
</compile_context>

<pallas_src>
import functools

import jax
import jax.numpy as jnp
from jax.experimental import pallas as pl
from jax.experimental.pallas import tpu as pltpu


def _round_up(x, m):
    return ((x + m - 1) // m) * m


def _lstm_chunk_kernel(Hp, CHUNK, T,
                       xproj_ref, state0_ref, whh_ref,
                       h_seq_ref, c_fin_ref,
                       h_ref, c_ref):
    """One grid step == CHUNK LSTM time steps. State carried in VMEM scratch."""
    g = pl.program_id(0)

    @pl.when(g == 0)
    def _init():
        # Padded lanes of h0 / c0 are exactly 0 (set in the glue); together
        # with zero padded weight rows/cols this keeps dead lanes at 0 forever.
        h_ref[...] = state0_ref[0:1, :]
        c_ref[...] = state0_ref[1:2, :]

    h = h_ref[...]                 # (1, Hp) f32 carry
    c = c_ref[...]                 # (1, Hp) f32 carry
    xp = xproj_ref[...]            # (CHUNK, 4Hp) — bias already folded in
    w = whh_ref[...]               # (Hp, 4Hp)   — resident recurrent weight

    needs_mask = (T % CHUNK) != 0
    rows = []
    for k in range(CHUNK):         # short static inner loop, fully unrolled
        lhs = h.astype(w.dtype) if w.dtype != h.dtype else h
        # Recurrent half only: (1, Hp) @ (Hp, 4Hp) on the MXU.
        gates = (jnp.dot(lhs, w, preferred_element_type=jnp.float32)
                 + xp[k:k + 1, :])

        # PyTorch gate order (i, f, g, o); slices are 128-lane aligned.
        i_g = jax.nn.sigmoid(gates[:, 0 * Hp:1 * Hp])
        f_g = jax.nn.sigmoid(gates[:, 1 * Hp:2 * Hp])
        g_g = jnp.tanh(gates[:, 2 * Hp:3 * Hp])
        o_g = jax.nn.sigmoid(gates[:, 3 * Hp:4 * Hp])

        c_new = f_g * c + i_g * g_g
        h_new = o_g * jnp.tanh(c_new)

        if needs_mask:
            # Freeze the carried state past the true sequence end (padded
            # tail of the last chunk); padded h_seq rows are sliced off later.
            valid = (g * CHUNK + k) < T
            c_new = jnp.where(valid, c_new, c)
            h_new = jnp.where(valid, h_new, h)

        h, c = h_new, c_new
        rows.append(h)

    # One full-tile (CHUNK, Hp) unmasked store per grid step.
    h_seq_ref[...] = jnp.concatenate(rows, axis=0).astype(h_seq_ref.dtype)

    # Carry state to the next chunk.
    h_ref[...] = h
    c_ref[...] = c

    @pl.when(g == pl.num_programs(0) - 1)
    def _finalize():
        c_fin_ref[...] = c_ref[...].astype(c_fin_ref.dtype)


def lstm_forward(tokens, emb_table, h0, c0, w_ih, w_hh, b_ih, b_hh,
                 weights_dtype=jnp.float32, chunk=8):
    """Run the LSTM over T token ids (T fused forward calls of the module).

    Args:
      tokens:    (T,) int32 token ids
      emb_table: (V, E) float32
      h0, c0:    (1, 1, H) float32
      w_ih:      (4H, E) float32   (PyTorch weight_ih_l0)
      w_hh:      (4H, H) float32   (PyTorch weight_hh_l0)
      b_ih,b_hh: (4H,)   float32
      weights_dtype: dtype of the resident recurrent weight (f32 or bf16).
      chunk:     timesteps processed per grid iteration.
    Returns:
      (output, (h_n, c_n)) with output: (T, 1, H), h_n/c_n: (1, 1, H).
      With T == 1 this is exactly LSTM.forward(input, h).
    """
    tokens = tokens.astype(jnp.int32)
    T = int(tokens.shape[0])
    V, E = emb_table.shape
    H = h0.shape[-1]

    Hp = _round_up(H, 128)          # lane-dense hidden / gate width
    f32 = jnp.float32
    CHUNK = int(chunk)
    num_chunks = pl.cdiv(T, CHUNK)
    Tp = num_chunks * CHUNK

    # ---- hoisted, non-recurrent input projection (one MXU-shaped matmul) ----
    emb = emb_table[tokens].astype(f32)                           # (T, E)
    xg = (emb @ w_ih.astype(f32).T
          + (b_ih + b_hh).astype(f32)).reshape(T, 4, H)           # (T, 4, H)
    xproj = (jnp.zeros((Tp, 4, Hp), f32)
             .at[:T, :, :H].set(xg)
             .reshape(Tp, 4 * Hp))                                # (Tp, 4Hp)

    # ---- recurrent weight, padded & gate-laid-out: (Hp, 4Hp) ----
    # w_hh_t[in, gate*Hp + out] = w_hh[gate*H + out, in]
    whh_p = jnp.zeros((4, Hp, Hp), f32).at[:, :H, :H].set(
        w_hh.astype(f32).reshape(4, H, H))
    w_hh_t = (jnp.transpose(whh_p, (2, 0, 1))
              .reshape(Hp, 4 * Hp).astype(weights_dtype))

    # ---- initial state fused into one (2, Hp) block; padded lanes exactly 0 ----
    state0 = jnp.zeros((2, Hp), f32)
    state0 = state0.at[0, :H].set(h0.reshape(H).astype(f32))
    state0 = state0.at[1, :H].set(c0.reshape(H).astype(f32))

    grid_spec = pltpu.PrefetchScalarGridSpec(
        num_scalar_prefetch=0,
        grid=(num_chunks,),
        in_specs=[
            # Per-chunk slab of the hoisted input projection.
            pl.BlockSpec((CHUNK, 4 * Hp), lambda g: (g, 0)),
            # Initial state / recurrent weight: constant index maps ->
            # fetched once, resident in VMEM for the whole grid.
            pl.BlockSpec((2, Hp), lambda g: (0, 0)),
            pl.BlockSpec((Hp, 4 * Hp), lambda g: (0, 0)),
        ],
        out_specs=[
            pl.BlockSpec((CHUNK, Hp), lambda g: (g, 0)),   # h_t per chunk
            pl.BlockSpec((1, Hp), lambda g: (0, 0)),       # final c
        ],
        scratch_shapes=[
            pltpu.VMEM((1, Hp), jnp.float32),              # hidden-state carry
            pltpu.VMEM((1, Hp), jnp.float32),              # cell-state carry
        ],
    )

    h_seq_p, c_fin_p = pl.pallas_call(
        functools.partial(_lstm_chunk_kernel, Hp, CHUNK, T),
        grid_spec=grid_spec,
        out_shape=(
            jax.ShapeDtypeStruct((Tp, Hp), jnp.float32),
            jax.ShapeDtypeStruct((1, Hp), jnp.float32),
        ),
        compiler_params=pltpu.CompilerParams(
            # Recurrence over time: must run sequentially (state in scratch).
            dimension_semantics=("arbitrary",)),
    )(xproj, state0, w_hh_t)

    output = h_seq_p[:T, :H].reshape(T, 1, H)
    h_n = output[-1].reshape(1, 1, H)
    c_n = c_fin_p[:, :H].reshape(1, 1, H)
    return output, (h_n, c_n)


def lstm_step(token, emb_table, h0, c0, w_ih, w_hh, b_ih, b_hh):
    """Exactly the original module's forward(input, h): one token."""
    out, (h_n, c_n) = lstm_forward(token.reshape(1), emb_table, h0, c0,
                                   w_ih, w_hh, b_ih, b_hh)
    return out.reshape(1, 1, -1), (h_n, c_n)


def _reference_lstm_seq(tokens, emb_table, h0, c0, w_ih, w_hh, b_ih, b_hh):
    """Pure-JAX reference: T successive PyTorch nn.LSTM single steps."""
    H = h0.shape[-1]
    h = h0.reshape(1, H)
    c = c0.reshape(1, H)
    outs = []
    for t in range(tokens.shape[0]):
        x = emb_table[tokens[t]].reshape(1, -1)
        gates = x @ w_ih.T + b_ih + h @ w_hh.T + b_hh
        i_g = jax.nn.sigmoid(gates[:, 0 * H:1 * H])
        f_g = jax.nn.sigmoid(gates[:, 1 * H:2 * H])
        g_g = jnp.tanh(gates[:, 2 * H:3 * H])
        o_g = jax.nn.sigmoid(gates[:, 3 * H:4 * H])
        c = f_g * c + i_g * g_g
        h = o_g * jnp.tanh(c)
        outs.append(h)
    output = jnp.stack(outs, axis=0).reshape(-1, 1, H)
    return output, (h.reshape(1, 1, H), c.reshape(1, 1, H))


if __name__ == "__main__":
    vocab_size = 64
    embedding_dim = 32
    hidden_dim = 32
    seq_len = 8

    key = jax.random.PRNGKey(0)
    (k_emb, k_wih, k_whh, k_bih, k_bhh, k_h, k_c, k_tok, k_tok2) = \
        jax.random.split(key, 9)

    bound = 1.0 / jnp.sqrt(hidden_dim)
    emb_table = jax.random.normal(k_emb, (vocab_size, embedding_dim), jnp.float32)
    w_ih = jax.random.uniform(k_wih, (4 * hidden_dim, embedding_dim),
                              jnp.float32, -bound, bound)
    w_hh = jax.random.uniform(k_whh, (4 * hidden_dim, hidden_dim),
                              jnp.float32, -bound, bound)
    b_ih = jax.random.uniform(k_bih, (4 * hidden_dim,), jnp.float32, -bound, bound)
    b_hh = jax.random.uniform(k_bhh, (4 * hidden_dim,), jnp.float32, -bound, bound)

    # init_hidden(): randn(1, 1, H) for h and c.
    h0 = jax.random.normal(k_h, (1, 1, hidden_dim), jnp.float32)
    c0 = jax.random.normal(k_c, (1, 1, hidden_dim), jnp.float32)

    tokens = jax.random.randint(k_tok, (seq_len,), 0, vocab_size, jnp.int32)

    # --- fused sequence: T forward calls in one pallas_call (f32 weights) ---
    output, (h_n, c_n) = lstm_forward(tokens, emb_table, h0, c0,
                                      w_ih, w_hh, b_ih, b_hh)
    jax.block_until_ready((output, h_n, c_n))

    ref_out, (ref_h, ref_c) = _reference_lstm_seq(tokens, emb_table, h0, c0,
                                                  w_ih, w_hh, b_ih, b_hh)
    assert output.shape == (seq_len, 1, hidden_dim)
    assert jnp.allclose(output, ref_out, atol=1e-5), "output mismatch"
    assert jnp.allclose(h_n, ref_h, atol=1e-5), "h_n mismatch"
    assert jnp.allclose(c_n, ref_c, atol=1e-5), "c_n mismatch"

    # --- ragged length (T not a multiple of CHUNK): exercises tail masking ---
    tokens13 = jax.random.randint(k_tok2, (13,), 0, vocab_size, jnp.int32)
    out13, (h13, c13) = lstm_forward(tokens13, emb_table, h0, c0,
                                     w_ih, w_hh, b_ih, b_hh)
    jax.block_until_ready((out13, h13, c13))
    ref13, (rh13, rc13) = _reference_lstm_seq(tokens13, emb_table, h0, c0,
                                              w_ih, w_hh, b_ih, b_hh)
    assert out13.shape == (13, 1, hidden_dim)
    assert jnp.allclose(out13, ref13, atol=1e-5), "ragged output mismatch"
    assert jnp.allclose(h13, rh13, atol=1e-5), "ragged h_n mismatch"
    assert jnp.allclose(c13, rc13, atol=1e-5), "ragged c_n mismatch"

    # --- single-step call == the original module's forward(input, h) ---
    out1, (h1, c1) = lstm_step(tokens[:1], emb_table, h0, c0,
                               w_ih, w_hh, b_ih, b_hh)
    jax.block_until_ready((out1, h1, c1))
    assert jnp.allclose(out1, ref_out[:1], atol=1e-5), "single-step mismatch"
    assert jnp.allclose(h1, ref_out[0].reshape(1, 1, -1), atol=1e-5)

    # --- bf16 resident recurrent weight (memory-bound path), loose tolerance ---
    out_bf, (h_bf, c_bf) = lstm_forward(tokens, emb_table, h0, c0,
                                        w_ih, w_hh, b_ih, b_hh,
                                        weights_dtype=jnp.bfloat16)
    jax.block_until_ready((out_bf, h_bf, c_bf))
    assert jnp.allclose(out_bf, ref_out, atol=1e-1), "bf16 output diverged"

    print("KERNEL_OK")
</pallas_src>

<mosaic_0001>
module attributes {stable_mosaic.version = 11 : i64} {
  func.func @_lstm_chunk_kernel(%arg0: i32, %arg1: memref<8x512xf32, #tpu.memory_space<vmem>>, %arg2: memref<2x128xf32, #tpu.memory_space<vmem>>, %arg3: memref<128x512xf32, #tpu.memory_space<vmem>>, %arg4: memref<8x128xf32, #tpu.memory_space<vmem>>, %arg5: memref<1x128xf32, #tpu.memory_space<vmem>>, %arg6: memref<1x128xf32, #tpu.memory_space<vmem>>, %arg7: memref<1x128xf32, #tpu.memory_space<vmem>>) attributes {dimension_semantics = [#tpu.dimension_semantics<arbitrary>], iteration_bounds = array<i64: 1>, scalar_prefetch = 0 : i64, scratch_operands = 2 : i64, tpu.core_type = #tpu.core_type<tc>, window_params = [{transform_indices = @transform_0, window_bounds = array<i64: 8, 512>}, {pipeline_mode = #tpu.pipeline_mode<synchronous>, transform_indices = @transform_1, window_bounds = array<i64: 2, 128>}, {pipeline_mode = #tpu.pipeline_mode<synchronous>, transform_indices = @transform_2, window_bounds = array<i64: 128, 512>}, {transform_indices = @transform_3, window_bounds = array<i64: 8, 128>}, {pipeline_mode = #tpu.pipeline_mode<synchronous>, transform_indices = @transform_4, window_bounds = array<i64: 1, 128>}]} {
    %c0_i32 = arith.constant 0 : i32
    %0 = arith.cmpi eq, %arg0, %c0_i32 : i32
    %1 = arith.extui %0 : i1 to i32
    %c0_i32_0 = arith.constant 0 : i32
    %2 = arith.cmpi ne, %1, %c0_i32_0 : i32
    scf.if %2 {
      %c0_47 = arith.constant 0 : index
      %c0_48 = arith.constant 0 : index
      %238 = vector.load %arg2[%c0_47, %c0_48] : memref<2x128xf32, #tpu.memory_space<vmem>>, vector<1x128xf32>
      %c0_49 = arith.constant 0 : index
      %c0_50 = arith.constant 0 : index
      %239 = vector.load %arg6[%c0_49, %c0_50] : memref<1x128xf32, #tpu.memory_space<vmem>>, vector<1x128xf32>
      tpu.vector_store %arg6[%c0_49, %c0_50], %238 {strides = array<i32>} : memref<1x128xf32, #tpu.memory_space<vmem>>, vector<1x128xf32>,
      %c1 = arith.constant 1 : index
      %c0_51 = arith.constant 0 : index
      %240 = vector.load %arg2[%c1, %c0_51] : memref<2x128xf32, #tpu.memory_space<vmem>>, vector<1x128xf32>
      %c0_52 = arith.constant 0 : index
      %c0_53 = arith.constant 0 : index
      %241 = vector.load %arg7[%c0_52, %c0_53] : memref<1x128xf32, #tpu.memory_space<vmem>>, vector<1x128xf32>
      tpu.vector_store %arg7[%c0_52, %c0_53], %240 {strides = array<i32>} : memref<1x128xf32, #tpu.memory_space<vmem>>, vector<1x128xf32>,
    } else {
    }
    %c0 = arith.constant 0 : index
    %c0_1 = arith.constant 0 : index
    %3 = vector.load %arg6[%c0, %c0_1] : memref<1x128xf32, #tpu.memory_space<vmem>>, vector<1x128xf32>
    %c0_2 = arith.constant 0 : index
    %c0_3 = arith.constant 0 : index
    %4 = vector.load %arg7[%c0_2, %c0_3] : memref<1x128xf32, #tpu.memory_space<vmem>>, vector<1x128xf32>
    %c0_4 = arith.constant 0 : index
    %c0_5 = arith.constant 0 : index
    %5 = vector.load %arg1[%c0_4, %c0_5] : memref<8x512xf32, #tpu.memory_space<vmem>>, vector<8x512xf32>
    %c0_6 = arith.constant 0 : index
    %c0_7 = arith.constant 0 : index
    %6 = vector.load %arg3[%c0_6, %c0_7] : memref<128x512xf32, #tpu.memory_space<vmem>>, vector<128x512xf32>
    %cst = arith.constant dense<0.000000e+00> : vector<1x512xf32>
    %7 = tpu.matmul %3, %6, %cst {dimension_numbers = #tpu.dot_dimension_numbers<[1], [0], [0], [1], [0, 0, 1, 1], [], []>} : vector<1x128xf32>, vector<128x512xf32>, vector<1x512xf32> -> vector<1x512xf32>
    %8 = vector.extract_strided_slice %5 {offsets = [0, 0], sizes = [1, 512], strides = [1, 1]} : vector<8x512xf32> to vector<1x512xf32>
    %9 = arith.addf %7, %8 : vector<1x512xf32>
    %10 = vector.extract_strided_slice %9 {offsets = [0, 0], sizes = [1, 128], strides = [1, 1]} : vector<1x512xf32> to vector<1x128xf32>
    %11 = arith.negf %10 : vector<1x128xf32>
    %12 = math.exp %11 : vector<1x128xf32>
    %cst_8 = arith.constant 1.000000e+00 : f32
    %13 = vector.broadcast %cst_8 : f32 to vector<1x128xf32>
    %14 = arith.addf %13, %12 : vector<1x128xf32>
    %15 = arith.divf %13, %14 : vector<1x128xf32>
    %16 = vector.extract_strided_slice %9 {offsets = [0, 128], sizes = [1, 128], strides = [1, 1]} : vector<1x512xf32> to vector<1x128xf32>
    %17 = arith.negf %16 : vector<1x128xf32>
    %18 = math.exp %17 : vector<1x128xf32>
    %cst_9 = arith.constant 1.000000e+00 : f32
    %19 = vector.broadcast %cst_9 : f32 to vector<1x128xf32>
    %20 = arith.addf %19, %18 : vector<1x128xf32>
    %21 = arith.divf %19, %20 : vector<1x128xf32>
    %22 = vector.extract_strided_slice %9 {offsets = [0, 256], sizes = [1, 128], strides = [1, 1]} : vector<1x512xf32> to vector<1x128xf32>
    %23 = math.tanh %22 : vector<1x128xf32>
    %24 = vector.extract_strided_slice %9 {offsets = [0, 384], sizes = [1, 128], strides = [1, 1]} : vector<1x512xf32> to vector<1x128xf32>
    %25 = arith.negf %24 : vector<1x128xf32>
    %26 = math.exp %25 : vector<1x128xf32>
    %cst_10 = arith.constant 1.000000e+00 : f32
    %27 = vector.broadcast %cst_10 : f32 to vector<1x128xf32>
    %28 = arith.addf %27, %26 : vector<1x128xf32>
    %29 = arith.divf %27, %28 : vector<1x128xf32>
    %30 = arith.mulf %21, %4 : vector<1x128xf32>
    %31 = arith.mulf %15, %23 : vector<1x128xf32>
    %32 = arith.addf %30, %31 : vector<1x128xf32>
    %33 = math.tanh %32 : vector<1x128xf32>
    %34 = arith.mulf %29, %33 : vector<1x128xf32>
    %cst_11 = arith.constant dense<0.000000e+00> : vector<1x512xf32>
    %35 = tpu.matmul %34, %6, %cst_11 {dimension_numbers = #tpu.dot_dimension_numbers<[1], [0], [0], [1], [0, 0, 1, 1], [], []>} : vector<1x128xf32>, vector<128x512xf32>, vector<1x512xf32> -> vector<1x512xf32>
    %36 = vector.extract_strided_slice %5 {offsets = [1, 0], sizes = [1, 512], strides = [1, 1]} : vector<8x512xf32> to vector<1x512xf32>
    %37 = arith.addf %35, %36 : vector<1x512xf32>
    %38 = vector.extract_strided_slice %37 {offsets = [0, 0], sizes = [1, 128], strides = [1, 1]} : vector<1x512xf32> to vector<1x128xf32>
    %39 = arith.negf %38 : vector<1x128xf32>
    %40 = math.exp %39 : vector<1x128xf32>
    %cst_12 = arith.constant 1.000000e+00 : f32
    %41 = vector.broadcast %cst_12 : f32 to vector<1x128xf32>
    %42 = arith.addf %41, %40 : vector<1x128xf32>
    %43 = arith.divf %41, %42 : vector<1x128xf32>
    %44 = vector.extract_strided_slice %37 {offsets = [0, 128], sizes = [1, 128], strides = [1, 1]} : vector<1x512xf32> to vector<1x128xf32>
    %45 = arith.negf %44 : vector<1x128xf32>
    %46 = math.exp %45 : vector<1x128xf32>
    %cst_13 = arith.constant 1.000000e+00 : f32
    %47 = vector.broadcast %cst_13 : f32 to vector<1x128xf32>
    %48 = arith.addf %47, %46 : vector<1x128xf32>
    %49 = arith.divf %47, %48 : vector<1x128xf32>
    %50 = vector.extract_strided_slice %37 {offsets = [0, 256], sizes = [1, 128], strides = [1, 1]} : vector<1x512xf32> to vector<1x128xf32>
    %51 = math.tanh %50 : vector<1x128xf32>
    %52 = vector.extract_strided_slice %37 {offsets = [0, 384], sizes = [1, 128], strides = [1, 1]} : vector<1x512xf32> to vector<1x128xf32>
    %53 = arith.negf %52 : vector<1x128xf32>
    %54 = math.exp %53 : vector<1x128xf32>
    %cst_14 = arith.constant 1.000000e+00 : f32
    %55 = vector.broadcast %cst_14 : f32 to vector<1x128xf32>
    %56 = arith.addf %55, %54 : vector<1x128xf32>
    %57 = arith.divf %55, %56 : vector<1x128xf32>
    %58 = arith.mulf %49, %32 : vector<1x128xf32>
    %59 = arith.mulf %43, %51 : vector<1x128xf32>
    %60 = arith.addf %58, %59 : vector<1x128xf32>
    %61 = math.tanh %60 : vector<1x128xf32>
    %62 = arith.mulf %57, %61 : vector<1x128xf32>
    %cst_15 = arith.constant dense<0.000000e+00> : vector<1x512xf32>
    %63 = tpu.matmul %62, %6, %cst_15 {dimension_numbers = #tpu.dot_dimension_numbers<[1], [0], [0], [1], [0, 0, 1, 1], [], []>} : vector<1x128xf32>, vector<128x512xf32>, vector<1x512xf32> -> vector<1x512xf32>
    %64 = vector.extract_strided_slice %5 {offsets = [2, 0], sizes = [1, 512], strides = [1, 1]} : vector<8x512xf32> to vector<1x512xf32>
    %65 = arith.addf %63, %64 : vector<1x512xf32>
    %66 = vector.extract_strided_slice %65 {offsets = [0, 0], sizes = [1, 128], strides = [1, 1]} : vector<1x512xf32> to vector<1x128xf32>
    %67 = arith.negf %66 : vector<1x128xf32>
    %68 = math.exp %67 : vector<1x128xf32>
    %cst_16 = arith.constant 1.000000e+00 : f32
    %69 = vector.broadcast %cst_16 : f32 to vector<1x128xf32>
    %70 = arith.addf %69, %68 : vector<1x128xf32>
    %71 = arith.divf %69, %70 : vector<1x128xf32>
    %72 = vector.extract_strided_slice %65 {offsets = [0, 128], sizes = [1, 128], strides = [1, 1]} : vector<1x512xf32> to vector<1x128xf32>
    %73 = arith.negf %72 : vector<1x128xf32>
    %74 = math.exp %73 : vector<1x128xf32>
    %cst_17 = arith.constant 1.000000e+00 : f32
    %75 = vector.broadcast %cst_17 : f32 to vector<1x128xf32>
    %76 = arith.addf %75, %74 : vector<1x128xf32>
    %77 = arith.divf %75, %76 : vector<1x128xf32>
    %78 = vector.extract_strided_slice %65 {offsets = [0, 256], sizes = [1, 128], strides = [1, 1]} : vector<1x512xf32> to vector<1x128xf32>
    %79 = math.tanh %78 : vector<1x128xf32>
    %80 = vector.extract_strided_slice %65 {offsets = [0, 384], sizes = [1, 128], strides = [1, 1]} : vector<1x512xf32> to vector<1x128xf32>
    %81 = arith.negf %80 : vector<1x128xf32>
    %82 = math.exp %81 : vector<1x128xf32>
    %cst_18 = arith.constant 1.000000e+00 : f32
    %83 = vector.broadcast %cst_18 : f32 to vector<1x128xf32>
    %84 = arith.addf %83, %82 : vector<1x128xf32>
    %85 = arith.divf %83, %84 : vector<1x128xf32>
    %86 = arith.mulf %77, %60 : vector<1x128xf32>
    %87 = arith.mulf %71, %79 : vector<1x128xf32>
    %88 = arith.addf %86, %87 : vector<1x128xf32>
    %89 = math.tanh %88 : vector<1x128xf32>
    %90 = arith.mulf %85, %89 : vector<1x128xf32>
    %cst_19 = arith.constant dense<0.000000e+00> : vector<1x512xf32>
    %91 = tpu.matmul %90, %6, %cst_19 {dimension_numbers = #tpu.dot_dimension_numbers<[1], [0], [0], [1], [0, 0, 1, 1], [], []>} : vector<1x128xf32>, vector<128x512xf32>, vector<1x512xf32> -> vector<1x512xf32>
    %92 = vector.extract_strided_slice %5 {offsets = [3, 0], sizes = [1, 512], strides = [1, 1]} : vector<8x512xf32> to vector<1x512xf32>
    %93 = arith.addf %91, %92 : vector<1x512xf32>
    %94 = vector.extract_strided_slice %93 {offsets = [0, 0], sizes = [1, 128], strides = [1, 1]} : vector<1x512xf32> to vector<1x128xf32>
    %95 = arith.negf %94 : vector<1x128xf32>
    %96 = math.exp %95 : vector<1x128xf32>
    %cst_20 = arith.constant 1.000000e+00 : f32
    %97 = vector.broadcast %cst_20 : f32 to vector<1x128xf32>
    %98 = arith.addf %97, %96 : vector<1x128xf32>
    %99 = arith.divf %97, %98 : vector<1x128xf32>
    %100 = vector.extract_strided_slice %93 {offsets = [0, 128], sizes = [1, 128], strides = [1, 1]} : vector<1x512xf32> to vector<1x128xf32>
    %101 = arith.negf %100 : vector<1x128xf32>
    %102 = math.exp %101 : vector<1x128xf32>
    %cst_21 = arith.constant 1.000000e+00 : f32
    %103 = vector.broadcast %cst_21 : f32 to vector<1x128xf32>
    %104 = arith.addf %103, %102 : vector<1x128xf32>
    %105 = arith.divf %103, %104 : vector<1x128xf32>
    %106 = vector.extract_strided_slice %93 {offsets = [0, 256], sizes = [1, 128], strides = [1, 1]} : vector<1x512xf32> to vector<1x128xf32>
    %107 = math.tanh %106 : vector<1x128xf32>
    %108 = vector.extract_strided_slice %93 {offsets = [0, 384], sizes = [1, 128], strides = [1, 1]} : vector<1x512xf32> to vector<1x128xf32>
    %109 = arith.negf %108 : vector<1x128xf32>
    %110 = math.exp %109 : vector<1x128xf32>
    %cst_22 = arith.constant 1.000000e+00 : f32
    %111 = vector.broadcast %cst_22 : f32 to vector<1x128xf32>
    %112 = arith.addf %111, %110 : vector<1x128xf32>
    %113 = arith.divf %111, %112 : vector<1x128xf32>
    %114 = arith.mulf %105, %88 : vector<1x128xf32>
    %115 = arith.mulf %99, %107 : vector<1x128xf32>
    %116 = arith.addf %114, %115 : vector<1x128xf32>
    %117 = math.tanh %116 : vector<1x128xf32>
    %118 = arith.mulf %113, %117 : vector<1x128xf32>
    %cst_23 = arith.constant dense<0.000000e+00> : vector<1x512xf32>
    %119 = tpu.matmul %118, %6, %cst_23 {dimension_numbers = #tpu.dot_dimension_numbers<[1], [0], [0], [1], [0, 0, 1, 1], [], []>} : vector<1x128xf32>, vector<128x512xf32>, vector<1x512xf32> -> vector<1x512xf32>
    %120 = vector.extract_strided_slice %5 {offsets = [4, 0], sizes = [1, 512], strides = [1, 1]} : vector<8x512xf32> to vector<1x512xf32>
    %121 = arith.addf %119, %120 : vector<1x512xf32>
    %122 = vector.extract_strided_slice %121 {offsets = [0, 0], sizes = [1, 128], strides = [1, 1]} : vector<1x512xf32> to vector<1x128xf32>
    %123 = arith.negf %122 : vector<1x128xf32>
    %124 = math.exp %123 : vector<1x128xf32>
    %cst_24 = arith.constant 1.000000e+00 : f32
    %125 = vector.broadcast %cst_24 : f32 to vector<1x128xf32>
    %126 = arith.addf %125, %124 : vector<1x128xf32>
    %127 = arith.divf %125, %126 : vector<1x128xf32>
    %128 = vector.extract_strided_slice %121 {offsets = [0, 128], sizes = [1, 128], strides = [1, 1]} : vector<1x512xf32> to vector<1x128xf32>
    %129 = arith.negf %128 : vector<1x128xf32>
    %130 = math.exp %129 : vector<1x128xf32>
    %cst_25 = arith.constant 1.000000e+00 : f32
    %131 = vector.broadcast %cst_25 : f32 to vector<1x128xf32>
    %132 = arith.addf %131, %130 : vector<1x128xf32>
    %133 = arith.divf %131, %132 : vector<1x128xf32>
    %134 = vector.extract_strided_slice %121 {offsets = [0, 256], sizes = [1, 128], strides = [1, 1]} : vector<1x512xf32> to vector<1x128xf32>
    %135 = math.tanh %134 : vector<1x128xf32>
    %136 = vector.extract_strided_slice %121 {offsets = [0, 384], sizes = [1, 128], strides = [1, 1]} : vector<1x512xf32> to vector<1x128xf32>
    %137 = arith.negf %136 : vector<1x128xf32>
    %138 = math.exp %137 : vector<1x128xf32>
    %cst_26 = arith.constant 1.000000e+00 : f32
    %139 = vector.broadcast %cst_26 : f32 to vector<1x128xf32>
    %140 = arith.addf %139, %138 : vector<1x128xf32>
    %141 = arith.divf %139, %140 : vector<1x128xf32>
    %142 = arith.mulf %133, %116 : vector<1x128xf32>
    %143 = arith.mulf %127, %135 : vector<1x128xf32>
    %144 = arith.addf %142, %143 : vector<1x128xf32>
    %145 = math.tanh %144 : vector<1x128xf32>
    %146 = arith.mulf %141, %145 : vector<1x128xf32>
    %cst_27 = arith.constant dense<0.000000e+00> : vector<1x512xf32>
    %147 = tpu.matmul %146, %6, %cst_27 {dimension_numbers = #tpu.dot_dimension_numbers<[1], [0], [0], [1], [0, 0, 1, 1], [], []>} : vector<1x128xf32>, vector<128x512xf32>, vector<1x512xf32> -> vector<1x512xf32>
    %148 = vector.extract_strided_slice %5 {offsets = [5, 0], sizes = [1, 512], strides = [1, 1]} : vector<8x512xf32> to vector<1x512xf32>
    %149 = arith.addf %147, %148 : vector<1x512xf32>
    %150 = vector.extract_strided_slice %149 {offsets = [0, 0], sizes = [1, 128], strides = [1, 1]} : vector<1x512xf32> to vector<1x128xf32>
    %151 = arith.negf %150 : vector<1x128xf32>
    %152 = math.exp %151 : vector<1x128xf32>
    %cst_28 = arith.constant 1.000000e+00 : f32
    %153 = vector.broadcast %cst_28 : f32 to vector<1x128xf32>
    %154 = arith.addf %153, %152 : vector<1x128xf32>
    %155 = arith.divf %153, %154 : vector<1x128xf32>
    %156 = vector.extract_strided_slice %149 {offsets = [0, 128], sizes = [1, 128], strides = [1, 1]} : vector<1x512xf32> to vector<1x128xf32>
    %157 = arith.negf %156 : vector<1x128xf32>
    %158 = math.exp %157 : vector<1x128xf32>
    %cst_29 = arith.constant 1.000000e+00 : f32
    %159 = vector.broadcast %cst_29 : f32 to vector<1x128xf32>
    %160 = arith.addf %159, %158 : vector<1x128xf32>
    %161 = arith.divf %159, %160 : vector<1x128xf32>
    %162 = vector.extract_strided_slice %149 {offsets = [0, 256], sizes = [1, 128], strides = [1, 1]} : vector<1x512xf32> to vector<1x128xf32>
    %163 = math.tanh %162 : vector<1x128xf32>
    %164 = vector.extract_strided_slice %149 {offsets = [0, 384], sizes = [1, 128], strides = [1, 1]} : vector<1x512xf32> to vector<1x128xf32>
    %165 = arith.negf %164 : vector<1x128xf32>
    %166 = math.exp %165 : vector<1x128xf32>
    %cst_30 = arith.constant 1.000000e+00 : f32
    %167 = vector.broadcast %cst_30 : f32 to vector<1x128xf32>
    %168 = arith.addf %167, %166 : vector<1x128xf32>
    %169 = arith.divf %167, %168 : vector<1x128xf32>
    %170 = arith.mulf %161, %144 : vector<1x128xf32>
    %171 = arith.mulf %155, %163 : vector<1x128xf32>
    %172 = arith.addf %170, %171 : vector<1x128xf32>
    %173 = math.tanh %172 : vector<1x128xf32>
    %174 = arith.mulf %169, %173 : vector<1x128xf32>
    %cst_31 = arith.constant dense<0.000000e+00> : vector<1x512xf32>
    %175 = tpu.matmul %174, %6, %cst_31 {dimension_numbers = #tpu.dot_dimension_numbers<[1], [0], [0], [1], [0, 0, 1, 1], [], []>} : vector<1x128xf32>, vector<128x512xf32>, vector<1x512xf32> -> vector<1x512xf32>
    %176 = vector.extract_strided_slice %5 {offsets = [6, 0], sizes = [1, 512], strides = [1, 1]} : vector<8x512xf32> to vector<1x512xf32>
    %177 = arith.addf %175, %176 : vector<1x512xf32>
    %178 = vector.extract_strided_slice %177 {offsets = [0, 0], sizes = [1, 128], strides = [1, 1]} : vector<1x512xf32> to vector<1x128xf32>
    %179 = arith.negf %178 : vector<1x128xf32>
    %180 = math.exp %179 : vector<1x128xf32>
    %cst_32 = arith.constant 1.000000e+00 : f32
    %181 = vector.broadcast %cst_32 : f32 to vector<1x128xf32>
    %182 = arith.addf %181, %180 : vector<1x128xf32>
    %183 = arith.divf %181, %182 : vector<1x128xf32>
    %184 = vector.extract_strided_slice %177 {offsets = [0, 128], sizes = [1, 128], strides = [1, 1]} : vector<1x512xf32> to vector<1x128xf32>
    %185 = arith.negf %184 : vector<1x128xf32>
    %186 = math.exp %185 : vector<1x128xf32>
    %cst_33 = arith.constant 1.000000e+00 : f32
    %187 = vector.broadcast %cst_33 : f32 to vector<1x128xf32>
    %188 = arith.addf %187, %186 : vector<1x128xf32>
    %189 = arith.divf %187, %188 : vector<1x128xf32>
    %190 = vector.extract_strided_slice %177 {offsets = [0, 256], sizes = [1, 128], strides = [1, 1]} : vector<1x512xf32> to vector<1x128xf32>
    %191 = math.tanh %190 : vector<1x128xf32>
    %192 = vector.extract_strided_slice %177 {offsets = [0, 384], sizes = [1, 128], strides = [1, 1]} : vector<1x512xf32> to vector<1x128xf32>
    %193 = arith.negf %192 : vector<1x128xf32>
    %194 = math.exp %193 : vector<1x128xf32>
    %cst_34 = arith.constant 1.000000e+00 : f32
    %195 = vector.broadcast %cst_34 : f32 to vector<1x128xf32>
    %196 = arith.addf %195, %194 : vector<1x128xf32>
    %197 = arith.divf %195, %196 : vector<1x128xf32>
    %198 = arith.mulf %189, %172 : vector<1x128xf32>
    %199 = arith.mulf %183, %191 : vector<1x128xf32>
    %200 = arith.addf %198, %199 : vector<1x128xf32>
    %201 = math.tanh %200 : vector<1x128xf32>
    %202 = arith.mulf %197, %201 : vector<1x128xf32>
    %cst_35 = arith.constant dense<0.000000e+00> : vector<1x512xf32>
    %203 = tpu.matmul %202, %6, %cst_35 {dimension_numbers = #tpu.dot_dimension_numbers<[1], [0], [0], [1], [0, 0, 1, 1], [], []>} : vector<1x128xf32>, vector<128x512xf32>, vector<1x512xf32> -> vector<1x512xf32>
    %204 = vector.extract_strided_slice %5 {offsets = [7, 0], sizes = [1, 512], strides = [1, 1]} : vector<8x512xf32> to vector<1x512xf32>
    %205 = arith.addf %203, %204 : vector<1x512xf32>
    %206 = vector.extract_strided_slice %205 {offsets = [0, 0], sizes = [1, 128], strides = [1, 1]} : vector<1x512xf32> to vector<1x128xf32>
    %207 = arith.negf %206 : vector<1x128xf32>
    %208 = math.exp %207 : vector<1x128xf32>
    %cst_36 = arith.constant 1.000000e+00 : f32
    %209 = vector.broadcast %cst_36 : f32 to vector<1x128xf32>
    %210 = arith.addf %209, %208 : vector<1x128xf32>
    %211 = arith.divf %209, %210 : vector<1x128xf32>
    %212 = vector.extract_strided_slice %205 {offsets = [0, 128], sizes = [1, 128], strides = [1, 1]} : vector<1x512xf32> to vector<1x128xf32>
    %213 = arith.negf %212 : vector<1x128xf32>
    %214 = math.exp %213 : vector<1x128xf32>
    %cst_37 = arith.constant 1.000000e+00 : f32
    %215 = vector.broadcast %cst_37 : f32 to vector<1x128xf32>
    %216 = arith.addf %215, %214 : vector<1x128xf32>
    %217 = arith.divf %215, %216 : vector<1x128xf32>
    %218 = vector.extract_strided_slice %205 {offsets = [0, 256], sizes = [1, 128], strides = [1, 1]} : vector<1x512xf32> to vector<1x128xf32>
    %219 = math.tanh %218 : vector<1x128xf32>
    %220 = vector.extract_strided_slice %205 {offsets = [0, 384], sizes = [1, 128], strides = [1, 1]} : vector<1x512xf32> to vector<1x128xf32>
    %221 = arith.negf %220 : vector<1x128xf32>
    %222 = math.exp %221 : vector<1x128xf32>
    %cst_38 = arith.constant 1.000000e+00 : f32
    %223 = vector.broadcast %cst_38 : f32 to vector<1x128xf32>
    %224 = arith.addf %223, %222 : vector<1x128xf32>
    %225 = arith.divf %223, %224 : vector<1x128xf32>
    %226 = arith.mulf %217, %200 : vector<1x128xf32>
    %227 = arith.mulf %211, %219 : vector<1x128xf32>
    %228 = arith.addf %226, %227 : vector<1x128xf32>
    %229 = math.tanh %228 : vector<1x128xf32>
    %230 = arith.mulf %225, %229 : vector<1x128xf32>
    %231 = tpu.concatenate %34, %62, %90, %118, %146, %174, %202, %230 in 0 : vector<1x128xf32>, vector<1x128xf32>, vector<1x128xf32>, vector<1x128xf32>, vector<1x128xf32>, vector<1x128xf32>, vector<1x128xf32>, vector<1x128xf32> -> vector<8x128xf32>
    %c0_39 = arith.constant 0 : index
    %c0_40 = arith.constant 0 : index
    %232 = vector.load %arg4[%c0_39, %c0_40] : memref<8x128xf32, #tpu.memory_space<vmem>>, vector<8x128xf32>
    tpu.vector_store %arg4[%c0_39, %c0_40], %231 {strides = array<i32>} : memref<8x128xf32, #tpu.memory_space<vmem>>, vector<8x128xf32>,
    %c0_41 = arith.constant 0 : index
    %c0_42 = arith.constant 0 : index
    %233 = vector.load %arg6[%c0_41, %c0_42] : memref<1x128xf32, #tpu.memory_space<vmem>>, vector<1x128xf32>
    tpu.vector_store %arg6[%c0_41, %c0_42], %230 {strides = array<i32>} : memref<1x128xf32, #tpu.memory_space<vmem>>, vector<1x128xf32>,
    %c0_43 = arith.constant 0 : index
    %c0_44 = arith.constant 0 : index
    %234 = vector.load %arg7[%c0_43, %c0_44] : memref<1x128xf32, #tpu.memory_space<vmem>>, vector<1x128xf32>
    tpu.vector_store %arg7[%c0_43, %c0_44], %228 {strides = array<i32>} : memref<1x128xf32, #tpu.memory_space<vmem>>, vector<1x128xf32>,
    %c0_i32_45 = arith.constant 0 : i32
    %235 = arith.cmpi eq, %arg0, %c0_i32_45 : i32
    %236 = arith.extui %235 : i1 to i32
    %c0_i32_46 = arith.constant 0 : i32
    %237 = arith.cmpi ne, %236, %c0_i32_46 : i32
    scf.if %237 {
      %c0_47 = arith.constant 0 : index
      %c0_48 = arith.constant 0 : index
      %238 = vector.load %arg7[%c0_47, %c0_48] : memref<1x128xf32, #tpu.memory_space<vmem>>, vector<1x128xf32>
      %c0_49 = arith.constant 0 : index
      %c0_50 = arith.constant 0 : index
      %239 = vector.load %arg5[%c0_49, %c0_50] : memref<1x128xf32, #tpu.memory_space<vmem>>, vector<1x128xf32>
      tpu.vector_store %arg5[%c0_49, %c0_50], %238 {strides = array<i32>} : memref<1x128xf32, #tpu.memory_space<vmem>>, vector<1x128xf32>,
    } else {
    }
    return
  }
  func.func @transform_0(%arg0: i32) -> (i32, i32) {
    %c0_i32 = arith.constant 0 : i32
    %c0_i32_0 = arith.constant 0 : i32
    return %arg0, %c0_i32 : i32, i32
  }
  func.func @transform_1(%arg0: i32) -> (i32, i32) {
    %c0_i32 = arith.constant 0 : i32
    %c0_i32_0 = arith.constant 0 : i32
    %c0_i32_1 = arith.constant 0 : i32
    return %c0_i32, %c0_i32_0 : i32, i32
  }
  func.func @transform_2(%arg0: i32) -> (i32, i32) {
    %c0_i32 = arith.constant 0 : i32
    %c0_i32_0 = arith.constant 0 : i32
    %c0_i32_1 = arith.constant 0 : i32
    return %c0_i32, %c0_i32_0 : i32, i32
  }
  func.func @transform_3(%arg0: i32) -> (i32, i32) {
    %c0_i32 = arith.constant 0 : i32
    %c0_i32_0 = arith.constant 0 : i32
    return %arg0, %c0_i32 : i32, i32
  }
  func.func @transform_4(%arg0: i32) -> (i32, i32) {
    %c0_i32 = arith.constant 0 : i32
    %c0_i32_0 = arith.constant 0 : i32
    %c0_i32_1 = arith.constant 0 : i32
    return %c0_i32, %c0_i32_0 : i32, i32
  }
}

</mosaic_0001>

<bundles_post_ra>
// kernel: tpu_custom_call.1
= control target key start
LH: loop header
LB: loop body
LE: loop exit
PB: predicated region body
PF: predicated region fallthrough
CT: control target
= control target key end

     0   :  { %10 = vsyncpa [#allocation5], 0  ;;  %s2856_s0 = inlined_call_operand.hbm [shape: f32[8,512], index: 0, kind: input, shape index: {}]   ;;  %s2857_s1 = inlined_call_operand.hbm [shape: f32[2,128], index: 1, kind: input, shape index: {}]   ;;  %s2858_s2 = inlined_call_operand.hbm [shape: f32[128,512], index: 2, kind: input, shape index: {}]   ;;  %s2859_s3 = inlined_call_operand.hbm [shape: f32[8,128], index: 3, kind: output, shape index: {0}]   ;;  %s2860_s4 = inlined_call_operand.hbm [shape: f32[1,128], index: 4, kind: output, shape index: {1}]  }
   0x1   :  { %11 = vsyncpa [#allocation8], 0 }
   0x2   :  { %12 = vsyncpa [#allocation6], 0 }
   0x3   :  { %13 = vsyncpa [#allocation12], 0  ;;  %s1930_s15 = smov [#allocation7]   ;;  %s1931_s17 = smov [#allocation4]  }
   0x4   :  { %s30_s16 = sshll.u32 %s1930_s15, 4  ;;  %s20_s18 = sshll.u32 %s1931_s17, 4  ;;  %s31_s16 = int_to_ptr.vmem [resolvable:$true] %s30_s16  ;;  %s21_s18 = int_to_ptr.vmem [resolvable:$true] %s20_s18 }
   0x5   :  { %s1830_s19 = scalar_lea.vmem %s31_s16, 32  ;;  %p1835_p1 = scmp.lt.s32.totalorder %s31_s16, %s31_s16 }
   0x6   :  { %p1831_p0 = scmp.ne.s32.totalorder %s31_s16, %s1830_s19  ;;  %p1836_p2 = scmp.lt.s32.totalorder %s1830_s19, %s1830_s19 }
   0x8   :  { %p1837_p3 = por %p1836_p2, %p1835_p1 }
   0xa   :  { %p1838_p4 = pnand %p1837_p3, %p1831_p0 }
   0xc   :  { %1841 = shalt.err (!%p1838_p4)
}
   0xd   :  { %33 = dma.hbm_to_vmem [thread:$0]  %s2857_s1, 32, %s31_s16, [#allocation8]  }
   0xe   :  { %s1850_s22 = scalar_lea.vmem %s21_s18, 512  ;;  %p1855_p6 = scmp.lt.s32.totalorder %s21_s18, %s21_s18 }
   0xf   :  { %p1851_p5 = scmp.ne.s32.totalorder %s21_s18, %s1850_s22  ;;  %p1856_p7 = scmp.lt.s32.totalorder %s1850_s22, %s1850_s22 }
  0x11   :  { %p1857_p8 = por %p1856_p7, %p1855_p6 }
  0x13   :  { %p1858_p9 = pnand %p1857_p8, %p1851_p5 }
  0x15   :  { %1861 = shalt.err (!%p1858_p9)
}
  0x16   :  { %23 = dma.hbm_to_vmem [thread:$0]  %s2856_s0, 512, %s21_s18, [#allocation5]  }
  0x17   :  { %s1932_s25 = smov [#allocation9]  }
  0x18   :  { %s39_s26 = sshll.u32 %s1932_s25, 4  ;;  %s40_s26 = int_to_ptr.vmem [resolvable:$true] %s39_s26 }
  0x19   :  { %s1870_s27 = scalar_lea.vmem %s40_s26, 8192  ;;  %p1875_p11 = scmp.lt.s32.totalorder %s40_s26, %s40_s26 }
  0x1a   :  { %p1871_p10 = scmp.ne.s32.totalorder %s40_s26, %s1870_s27  ;;  %p1876_p12 = scmp.lt.s32.totalorder %s1870_s27, %s1870_s27 }
  0x1c   :  { %p1877_p13 = por %p1876_p12, %p1875_p11 }
  0x1e   :  { %p1878_p0 = pnand %p1877_p13, %p1871_p10 }
  0x20   :  { %1881 = shalt.err (!%p1878_p0)
}
  0x21   :  { %s1933_s1 = smov 512   ;;  %s1934_s28 = smov 32  }
  0x22   :  { %45 = dma.hbm_to_vmem [thread:$0]  %s2858_s2, 8192, %s40_s26, [#allocation8], %s1933_s1, %s1933_s1, %s1934_s28  }
  0x23   :  { %1922 = dma.done.wait [#allocation5], 512  }
  0x24   :  { %1923 = vsyncadd [#allocation5], 4294966784 }
  0x25   :  { %1924 = dma.done.wait [#allocation8], 8224  }
  0x26   :  { %1925 = vsyncadd [#allocation8], 4294959072  ;;  %v2861_v0 = vmov 0.0   ;;  %v1974_v1 = vld [vmem:[#allocation9 + $0x1e8] sm:$0xff]  ;;  %v1976_v2 = vld [vmem:[#allocation9 + $0x1e0] sm:$0xff]  ;;  %vm1542_vm0 = vcmask 1040384  }
  0x27   :  { %197 = vmatprep.mubr.f32.mxu0 %v2861_v0  ;;  %268 = vmatprep.mubr.f32.mxu1 %v2861_v0  ;;  %2957 = vst [vmem:[#allocation17_spill] sm:$0xff] %v1974_v1  ;;  %v1978_v3 = vld [vmem:[#allocation9 + $0x1c8] sm:$0xff]  ;;  %v1981_v4 = vld [vmem:[#allocation9 + $0x1c0] sm:$0xff]  ;;  %v1995_v9 = vld [vmem:[#allocation9 + $0x1f8] sm:$0xff]  ;;  %vm1544_vm1 = vcmask 1041408   ;;  %vm1546_vm2 = vcmask 1042432  }
  0x28   :  { %133 = vmatprep.subr.mxu0 %v1974_v1  ;;  %v1984_v5 = vld [vmem:[#allocation9 + $0x1a8] sm:$0xff]  ;;  %v1987_v6 = vld [vmem:[#allocation9 + $0x1a0] sm:$0xff]  ;;  %2958 = vst [vmem:[#allocation18_spill] sm:$0xff] %v1995_v9  ;;  %204 = vmatprep.subr.mxu1 %v1995_v9  ;;  %v2001_v11 = vld [vmem:[#allocation9 + $0x1f0] sm:$0xff]  ;;  %vm1548_vm3 = vcmask 1043456   ;;  %vm1550_vm4 = vcmask 1044480  }
  0x29   :  { %134 = vmatpush1.msra.mxu0 %v1976_v2  ;;  %v1990_v7 = vld [vmem:[#allocation9 + $0x188] sm:$0xff]  ;;  %v1993_v8 = vld [vmem:[#allocation9 + $0x180] sm:$0xff]  ;;  %205 = vmatpush1.msra.mxu1 %v2001_v11  ;;  %v2007_v13 = vld [vmem:[#allocation9 + $0x1d8] sm:$0xff]  ;;  %vm1552_vm5 = vcmask 1045504   ;;  %s1936_s0 = smov [#allocation11]  }
  0x2a   :  { %135 = vmatprep.subr.mxu0 %v1978_v3  ;;  %v1998_v10 = vld [vmem:[#allocation9 + $0x168] sm:$0xff]  ;;  %v2004_v12 = vld [vmem:[#allocation9 + $0x160] sm:$0xff]  ;;  %v2009_v14 = vld [vmem:[#allocation9 + $0x1d0] sm:$0xff]  ;;  %206 = vmatprep.subr.mxu1 %v2007_v13  ;;  %s1580_s2 = sshll.u32 %s1936_s0, 4  ;;  %s1581_s2 = int_to_ptr.vmem [resolvable:$true] %s1580_s2 }
  0x2b   :  { %136 = vmatpush1.msra.mxu0 %v1981_v4  ;;  %v2012_v15 = vld [vmem:[#allocation9 + $0x148] sm:$0xff]  ;;  %v2015_v16 = vld [vmem:[#allocation9 + $0x1b8] sm:$0xff]  ;;  %v2018_v17 = vld [vmem:[#allocation9 + $0x140] sm:$0xff]  ;;  %207 = vmatpush1.msra.mxu1 %v2009_v14  ;;  %s1882_s5 = scalar_lea.vmem %s1581_s2, 16  ;;  %s1886_s6 = scalar_lea.vmem %s1581_s2, 32 }
  0x2c   :  { %137 = vmatprep.subr.mxu0 %v1984_v5  ;;  %v2021_v18 = vld [vmem:[#allocation9 + $0x1b0] sm:$0xff]  ;;  %v2023_v19 = vld [vmem:[#allocation9 + $0x198] sm:$0xff]  ;;  %v2026_v20 = vld [vmem:[#allocation9 + $0x128] sm:$0xff]  ;;  %208 = vmatprep.subr.mxu1 %v2015_v16  ;;  %p1883_p1 = scmp.ne.s32.totalorder %s1581_s2, %s1882_s5  ;;  %p1887_p2 = scmp.lt.s32.totalorder %s1581_s2, %s1581_s2 }
  0x2d   :  { %138 = vmatpush1.msra.mxu0 %v1987_v6  ;;  %v2029_v21 = vld [vmem:[#allocation9 + $0x190] sm:$0xff]  ;;  %v2032_v22 = vld [vmem:[#allocation9 + $0x120] sm:$0xff]  ;;  %209 = vmatpush1.msra.mxu1 %v2021_v18  ;;  %v2035_v23 = vld [vmem:[#allocation9 + $0x178] sm:$0xff]  ;;  %p1888_p3 = scmp.lt.s32.totalorder %s1886_s6, %s1882_s5 }
  0x2e   :  { %139 = vmatprep.subr.mxu0 %v1990_v7  ;;  %v2038_v24 = vld [vmem:[#allocation9 + $0x108] sm:$0xff]  ;;  %210 = vmatprep.subr.mxu1 %v2023_v19  ;;  %v2041_v25 = vld [vmem:[#allocation9 + $0x170] sm:$0xff]  ;;  %v2044_v26 = vld [vmem:[#allocation9 + $0x100] sm:$0xff] }
  0x2f   :  { %140 = vmatpush1.msra.mxu0 %v1993_v8  ;;  %211 = vmatpush1.msra.mxu1 %v2029_v21  ;;  %v2047_v27 = vld [vmem:[#allocation9 + $0x158] sm:$0xff]  ;;  %v2050_v28 = vld [vmem:[#allocation9 + $0xe8] sm:$0xff]  ;;  %v2053_v29 = vld [vmem:[#allocation9 + $0x150] sm:$0xff]  ;;  %p1889_p4 = por %p1888_p3, %p1887_p2 }
  0x30   :  { %141 = vmatprep.subr.mxu0 %v1998_v10  ;;  %212 = vmatprep.subr.mxu1 %v2035_v23  ;;  %v2056_v30 = vld [vmem:[#allocation9 + $0xe0] sm:$0xff]  ;;  %v2059_v31 = vld [vmem:[#allocation9 + $0x138] sm:$0xff]  ;;  %v2062_v32 = vld [vmem:[#allocation9 + $0xc8] sm:$0xff] }
  0x31   :  { %142 = vmatpush1.msra.mxu0 %v2004_v12  ;;  %213 = vmatpush1.msra.mxu1 %v2041_v25  ;;  %v2065_v33 = vld [vmem:[#allocation9 + $0x130] sm:$0xff]  ;;  %v59_v34 = vld [vmem:[#allocation7] sm:$0x1]  ;;  %v2068_v35 = vld [vmem:[#allocation9 + $0xc0] sm:$0xff]  ;;  %p1890_p5 = pnand %p1889_p4, %p1883_p1 }
  0x32   :  { %143 = vmatprep.subr.mxu0 %v2012_v15  ;;  %214 = vmatprep.subr.mxu1 %v2047_v27  ;;  %v2071_v36 = vld [vmem:[#allocation9 + $0x118] sm:$0xff]  ;;  %60 = vst [vmem:[#allocation2] sm:$0x1] %v59_v34  ;;  %v2074_v37 = vld [vmem:[#allocation9 + $0xa8] sm:$0xff]  ;;  %v2077_v38 = vld [vmem:[#allocation9 + $0x110] sm:$0xff] }
  0x33   :  { %144 = vmatpush1.msra.mxu0 %v2018_v17  ;;  %215 = vmatpush1.msra.mxu1 %v2053_v29  ;;  %v2080_v39 = vld [vmem:[#allocation9 + $0xa0] sm:$0xff]  ;;  %v2083_v40 = vld [vmem:[#allocation9 + $0xf8] sm:$0xff]  ;;  %v2086_v41 = vld [vmem:[#allocation9 + $0x88] sm:$0xff] }
  0x34   :  { %145 = vmatprep.subr.mxu0 %v2026_v20  ;;  %216 = vmatprep.subr.mxu1 %v2059_v31  ;;  %2959 = vst [vmem:[#allocation19_spill] sm:$0xff] %v2086_v41  ;;  %v2089_v42 = vld [vmem:[#allocation9 + $0xf0] sm:$0xff]  ;;  %v2092_v43 = vld [vmem:[#allocation9 + $0x80] sm:$0xff]  ;;  %v2095_v44 = vld [vmem:[#allocation9 + $0xd8] sm:$0xff] }
  0x35   :  { %146 = vmatpush1.msra.mxu0 %v2032_v22  ;;  %217 = vmatpush1.msra.mxu1 %v2065_v33  ;;  %2960 = vst [vmem:[#allocation20_spill] sm:$0xff] %v2092_v43  ;;  %v2098_v45 = vld [vmem:[#allocation9 + $0x68] sm:$0xff]  ;;  %v2101_v46 = vld [vmem:[#allocation9 + $0xd0] sm:$0xff]  ;;  %v2104_v47 = vld [vmem:[#allocation9 + $0x60] sm:$0xff] }
  0x36   :  { %147 = vmatprep.subr.mxu0 %v2038_v24  ;;  %218 = vmatprep.subr.mxu1 %v2071_v36  ;;  %2961 = vst [vmem:[#allocation21_spill] sm:$0xff] %v2098_v45  ;;  %2962 = vst [vmem:[#allocation22_spill] sm:$0xff] %v2104_v47  ;;  %v2107_v48 = vld [vmem:[#allocation9 + $0xb8] sm:$0xff]  ;;  %v2110_v49 = vld [vmem:[#allocation9 + $0x48] sm:$0xff] }
  0x37   :  { %148 = vmatpush1.msra.mxu0 %v2044_v26  ;;  %219 = vmatpush1.msra.mxu1 %v2077_v38  ;;  %2963 = vst [vmem:[#allocation23_spill] sm:$0xff] %v2110_v49  ;;  %v2113_v50 = vld [vmem:[#allocation9 + $0xb0] sm:$0xff]  ;;  %v2116_v51 = vld [vmem:[#allocation9 + $0x40] sm:$0xff]  ;;  %v2119_v52 = vld [vmem:[#allocation9 + $0x98] sm:$0xff] }
  0x38   :  { %149 = vmatprep.subr.mxu0 %v2050_v28  ;;  %220 = vmatprep.subr.mxu1 %v2083_v40  ;;  %2964 = vst [vmem:[#allocation24_spill] sm:$0xff] %v2116_v51  ;;  %2965 = vst [vmem:[#allocation25_spill] sm:$0xff] %v2119_v52  ;;  %v2122_v53 = vld [vmem:[#allocation9 + $0x28] sm:$0xff]  ;;  %v2125_v54 = vld [vmem:[#allocation9 + $0x90] sm:$0xff] }
  0x39   :  { %150 = vmatpush1.msra.mxu0 %v2056_v30  ;;  %221 = vmatpush1.msra.mxu1 %v2089_v42  ;;  %2966 = vst [vmem:[#allocation26_spill] sm:$0xff] %v2122_v53  ;;  %2967 = vst [vmem:[#allocation27_spill] sm:$0xff] %v2125_v54  ;;  %v2128_v55 = vld [vmem:[#allocation9 + $0x20] sm:$0xff]  ;;  %v2131_v56 = vld [vmem:[#allocation9 + $0x78] sm:$0xff] }
  0x3a   :  { %151 = vmatprep.subr.mxu0 %v2062_v32  ;;  %222 = vmatprep.subr.mxu1 %v2095_v44  ;;  %2968 = vst [vmem:[#allocation28_spill] sm:$0xff] %v2128_v55  ;;  %2969 = vst [vmem:[#allocation29_spill] sm:$0xff] %v2131_v56  ;;  %v2134_v57 = vld [vmem:[#allocation9 + $0x8] sm:$0xff]  ;;  %v2137_v58 = vld [vmem:[#allocation9 + $0x70] sm:$0xff] }
  0x3b   :  { %152 = vmatpush1.msra.mxu0 %v2068_v35  ;;  %223 = vmatpush1.msra.mxu1 %v2101_v46  ;;  %2970 = vst [vmem:[#allocation30_spill] sm:$0xff] %v2134_v57  ;;  %2971 = vst [vmem:[#allocation31_spill] sm:$0xff] %v2137_v58  ;;  %v2140_v59 = vld [vmem:[#allocation9] sm:$0xff]  ;;  %v2143_v60 = vld [vmem:[#allocation9 + $0x58] sm:$0xff] }
  0x3c   :  { %153 = vmatprep.subr.mxu0 %v2074_v37  ;;  %224 = vmatprep.subr.mxu1 %v2107_v48  ;;  %2972 = vst [vmem:[#allocation32_spill] sm:$0xff] %v2140_v59  ;;  %2973 = vst [vmem:[#allocation33_spill] sm:$0xff] %v2143_v60  ;;  %v63_v61 = vld [vmem:[#allocation2] sm:$0x1]  ;;  %v2147_v62 = vld [vmem:[#allocation9 + $0x50] sm:$0xff] }
  0x3d   :  { %154 = vmatpush1.msra.mxu0 %v2080_v39  ;;  %225 = vmatpush1.msra.mxu1 %v2113_v50  ;;  %2974 = vst [vmem:[#allocation34_spill] sm:$0xff] %v2147_v62  ;;  %v2151_v63 = vld [vmem:[#allocation9 + $0x38] sm:$0xff]  ;;  %v2155_v34 = vld [vmem:[#allocation9 + $0x30] sm:$0xff] }
  0x3e   :  { %155 = vmatprep.subr.mxu0 %v2086_v41  ;;  %226 = vmatprep.subr.mxu1 %v2119_v52  ;;  %2975 = vst [vmem:[#allocation35_spill] sm:$0xff] %v2151_v63  ;;  %2976 = vst [vmem:[#allocation36_spill] sm:$0xff] %v2155_v34  ;;  %v2158_v0 = vld [vmem:[#allocation9 + $0x18] sm:$0xff] }
  0x3f   :  { %156 = vmatpush1.msra.mxu0 %v2092_v43  ;;  %227 = vmatpush1.msra.mxu1 %v2125_v54  ;;  %2977 = vst [vmem:[#allocation37_spill] sm:$0xff] %v2158_v0 }
  0x40   :  { %157 = vmatprep.subr.mxu0 %v2098_v45  ;;  %228 = vmatprep.subr.mxu1 %v2131_v56 }
  0x41   :  { %158 = vmatpush1.msra.mxu0 %v2104_v47  ;;  %229 = vmatpush1.msra.mxu1 %v2137_v58 }
  0x42   :  { %159 = vmatprep.subr.mxu0 %v2110_v49  ;;  %230 = vmatprep.subr.mxu1 %v2143_v60 }
  0x43   :  { %160 = vmatpush1.msra.mxu0 %v2116_v51  ;;  %231 = vmatpush1.msra.mxu1 %v2147_v62 }
  0x44   :  { %161 = vmatprep.subr.mxu0 %v2122_v53  ;;  %232 = vmatprep.subr.mxu1 %v2151_v63 }
  0x45   :  { %162 = vmatpush1.msra.mxu0 %v2128_v55  ;;  %v2161_v55 = vld [vmem:[#allocation9 + $0x10] sm:$0xff]  ;;  %233 = vmatpush1.msra.mxu1 %v2155_v34 }
  0x46   :  { %163 = vmatprep.subr.mxu0 %v2134_v57  ;;  %2978 = vst [vmem:[#allocation38_spill] sm:$0xff] %v2161_v55  ;;  %234 = vmatprep.subr.mxu1 %v2158_v0 }
  0x47   :  { %164 = vmatpush1.msra.mxu0 %v2140_v59  ;;  %235 = vmatpush1.msra.mxu1 %v2161_v55 }
  0x48   :  { %198 = vmatmul.mubr.f32.vlgmr.msra.gmra.mxu0 %v63_v61  ;;  %311 = vmatprep.subr.mxu0 %v1974_v1 }
  0x49   :  { %312 = vmatpush1.msra.mxu0 %v1976_v2  ;;  %269 = vmatmul.mubr.f32.vlgmr.msra.gmra.mxu1 %v63_v61  ;;  %v2979_v61 = vld [vmem:[#allocation28_spill] sm:$0xff] }
  0x4a   :  { %313 = vmatprep.subr.mxu0 %v1978_v3  ;;  %382 = vmatprep.subr.mxu1 %v1995_v9 }
  0x4b   :  { %314 = vmatpush1.msra.mxu0 %v1981_v4  ;;  %383 = vmatpush1.msra.mxu1 %v2001_v11 }
  0x4c   :  { %315 = vmatprep.subr.mxu0 %v1984_v5  ;;  %384 = vmatprep.subr.mxu1 %v2007_v13 }
  0x4d   :  { %316 = vmatpush1.msra.mxu0 %v1987_v6  ;;  %385 = vmatpush1.msra.mxu1 %v2009_v14 }
  0x4e   :  { %317 = vmatprep.subr.mxu0 %v1990_v7  ;;  %386 = vmatprep.subr.mxu1 %v2015_v16 }
  0x4f   :  { %318 = vmatpush1.msra.mxu0 %v1993_v8  ;;  %387 = vmatpush1.msra.mxu1 %v2021_v18 }
  0x50   :  { %319 = vmatprep.subr.mxu0 %v1998_v10  ;;  %388 = vmatprep.subr.mxu1 %v2023_v19 }
  0x51   :  { %320 = vmatpush1.msra.mxu0 %v2004_v12  ;;  %389 = vmatpush1.msra.mxu1 %v2029_v21 }
  0x52   :  { %321 = vmatprep.subr.mxu0 %v2012_v15  ;;  %390 = vmatprep.subr.mxu1 %v2035_v23 }
  0x53   :  { %322 = vmatpush1.msra.mxu0 %v2018_v17  ;;  %391 = vmatpush1.msra.mxu1 %v2041_v25 }
  0x54   :  { %323 = vmatprep.subr.mxu0 %v2026_v20  ;;  %392 = vmatprep.subr.mxu1 %v2047_v27 }
  0x55   :  { %324 = vmatpush1.msra.mxu0 %v2032_v22  ;;  %393 = vmatpush1.msra.mxu1 %v2053_v29 }
  0x56   :  { %325 = vmatprep.subr.mxu0 %v2038_v24  ;;  %394 = vmatprep.subr.mxu1 %v2059_v31 }
  0x57   :  { %326 = vmatpush1.msra.mxu0 %v2044_v26  ;;  %395 = vmatpush1.msra.mxu1 %v2065_v33 }
  0x58   :  { %327 = vmatprep.subr.mxu0 %v2050_v28  ;;  %396 = vmatprep.subr.mxu1 %v2071_v36 }
  0x59   :  { %328 = vmatpush1.msra.mxu0 %v2056_v30  ;;  %397 = vmatpush1.msra.mxu1 %v2077_v38 }
  0x5a   :  { %329 = vmatprep.subr.mxu0 %v2062_v32  ;;  %398 = vmatprep.subr.mxu1 %v2083_v40 }
  0x5b   :  { %330 = vmatpush1.msra.mxu0 %v2068_v35  ;;  %399 = vmatpush1.msra.mxu1 %v2089_v42 }
  0x5c   :  { %331 = vmatprep.subr.mxu0 %v2074_v37  ;;  %400 = vmatprep.subr.mxu1 %v2095_v44 }
  0x5d   :  { %332 = vmatpush1.msra.mxu0 %v2080_v39  ;;  %401 = vmatpush1.msra.mxu1 %v2101_v46 }
  0x5e   :  { %333 = vmatprep.subr.mxu0 %v2086_v41  ;;  %402 = vmatprep.subr.mxu1 %v2107_v48 }
  0x5f   :  { %334 = vmatpush1.msra.mxu0 %v2092_v43  ;;  %403 = vmatpush1.msra.mxu1 %v2113_v50 }
  0x60   :  { %335 = vmatprep.subr.mxu0 %v2098_v45  ;;  %404 = vmatprep.subr.mxu1 %v2119_v52 }
  0x61   :  { %336 = vmatpush1.msra.mxu0 %v2104_v47  ;;  %405 = vmatpush1.msra.mxu1 %v2125_v54 }
  0x62   :  { %337 = vmatprep.subr.mxu0 %v2110_v49  ;;  %406 = vmatprep.subr.mxu1 %v2131_v56  ;;  %v2980_v49 = vmov 0.0  }
  0x63   :  { %338 = vmatpush1.msra.mxu0 %v2116_v51  ;;  %407 = vmatpush1.msra.mxu1 %v2137_v58  ;;  %v2242_v51 = vld [vmem:[#allocation4 + $0x10] sm:$0xff] }
  0x64   :  { %339 = vmatprep.subr.mxu0 %v2122_v53  ;;  %408 = vmatprep.subr.mxu1 %v2143_v60 }
  0x65   :  { %340 = vmatpush1.msra.mxu0 %v2979_v61  ;;  %409 = vmatpush1.msra.mxu1 %v2147_v62  ;;  %v61_v61 = vld [vmem:[#allocation7 + $0x1] sm:$0x1] }
  0x66   :  { %341 = vmatprep.subr.mxu0 %v2134_v57  ;;  %410 = vmatprep.subr.mxu1 %v2151_v63  ;;  %62 = vst [vmem:[#allocation3] sm:$0x1] %v61_v61  ;;  %v2234_v57 = vld [vmem:[#allocation4] sm:$0xff] }
  0x67   :  { %342 = vmatpush1.msra.mxu0 %v2140_v59  ;;  %411 = vmatpush1.msra.mxu1 %v2155_v34  ;;  %2981 = vst [vmem:[#allocation39_spill] sm:$0xff] %v2234_v57  ;;  %v2236_v59 = vld [vmem:[#allocation4 + $0x8] sm:$0xff] }
  0x68   :  { %375 = vmatprep.mubr.f32.mxu0 %v2980_v49  ;;  %412 = vmatprep.subr.mxu1 %v2158_v0  ;;  %2982 = vst [vmem:[#allocation40_spill] sm:$0xff] %v2236_v59 }
  0x69   :  { %446 = vmatprep.mubr.f32.mxu1 %v2980_v49  ;;  %413 = vmatpush1.msra.mxu1 %v2161_v55 }
  0x6a   :  { %485 = vmatprep.subr.mxu0 %v1974_v1  ;;  %556 = vmatprep.subr.mxu1 %v1995_v9  ;;  %v2240_v1 = vld [vmem:[#allocation4 + $0x18] sm:$0xff] }
 0x108   :  { %v199_v63 = vpop.f32.mrf.mxu0 }
 0x109   :  { %v200_v34 = vadd.f32 %v199_v63, %v2234_v57  ;;  %v270_v55 = vpop.f32.mrf.mxu1 }
 0x10a   :  { %v201_v53 = vpop.f32.mrf.mxu0  ;;  %v271_v60 = vadd.f32 %v270_v55, %v2242_v51 }
 0x10b   :  { %v1594_v62 = vmul.f32 -1.442695, %v200_v34  ;;  %v202_v0 = vadd.f32 %v201_v53, %v2236_v59  ;;  %v272_v9 = vpop.f32.mrf.mxu1  ;;  %v64_v59 = vld [vmem:[#allocation3] sm:$0x1] }
 0x10c   :  { %v273_v61 = vadd.f32 %v272_v9, %v2240_v1 }
 0x10d   :  { %1626 = vpow2.f32 %v1594_v62  ;;  %v1595_v49 = vmul.f32 -1.442695, %v202_v0 }
 0x10e   :  { %v1596_v58 = vmul.f32 -1.442695, %v273_v61  ;;  %v2990_v61 = vld [vmem:[#allocation33_spill] sm:$0xff] }
 0x10f   :  { %1628 = vpow2.f32 %v1595_v49 }
 0x110   :  { %1630 = vtanh.f32 %v271_v60 }
 0x111   :  { %1632 = vpow2.f32 %v1596_v58  ;;  %v2988_v58 = vld [vmem:[#allocation31_spill] sm:$0xff] }
 0x11a   :  { %v1627_v47 = vpop.eup %1626 }
 0x11b   :  { %v278_v63 = vadd.f32 1.0, %v1627_v47 }
 0x11c   :  { %v1629_v34 = vpop.eup %1628 }
 0x11d   :  { %1634 = vrcp.f32 %v278_v63  ;;  %v284_v53 = vadd.f32 1.0, %v1629_v34  ;;  %v1631_v0 = vpop.eup %1630  ;;  %v2991_v63 = vld [vmem:[#allocation24_spill] sm:$0xff]  ;;  %v2992_v34 = vld [vmem:[#allocation34_spill] sm:$0xff] }
 0x11e   :  { %v1633_v49 = vpop.eup %1632 }
 0x11f   :  { %1636 = vrcp.f32 %v284_v53  ;;  %v291_v56 = vadd.f32 1.0, %v1633_v49  ;;  %v2993_v53 = vld [vmem:[#allocation26_spill] sm:$0xff]  ;;  %v2995_v49 = vld [vmem:[#allocation28_spill] sm:$0xff] }
 0x121   :  { %1638 = vrcp.f32 %v291_v56  ;;  %v2986_v56 = vld [vmem:[#allocation29_spill] sm:$0xff] }
 0x12a   :  { %v1635_v62 = vpop.eup %1634 }
 0x12b   :  { %v295_v54 = vmul.f32 %v1635_v62, %v1631_v0  ;;  %v2994_v0 = vld [vmem:[#allocation35_spill] sm:$0xff]  ;;  %v2996_v62 = vld [vmem:[#allocation36_spill] sm:$0xff] }
 0x12c   :  { %v1637_v57 = vpop.eup %1636 }
 0x12d   :  { %v294_v45 = vmul.f32 %v1637_v57, %v64_v59  ;;  %v2987_v57 = vld [vmem:[#allocation22_spill] sm:$0xff]  ;;  %v2989_v59 = vld [vmem:[#allocation23_spill] sm:$0xff] }
 0x12e   :  { %v1639_v47 = vpop.eup %1638 }
 0x12f   :  { %v2246_v9 = vadd.f32 %v295_v54, %v294_v45  ;;  %v2984_v45 = vld [vmem:[#allocation27_spill] sm:$0xff]  ;;  %v2985_v54 = vld [vmem:[#allocation21_spill] sm:$0xff] }
 0x131   :  { %1640 = vtanh.f32 %v2246_v9 }
 0x13e   :  { %v1641_v55 = vpop.eup %1640 }
 0x13f   :  { %v2249_v60 = vmul.f32 %v1641_v55, %v1639_v47  ;;  %v2997_v47 = vld [vmem:[#allocation30_spill] sm:$0xff]  ;;  %v2998_v55 = vld [vmem:[#allocation37_spill] sm:$0xff] }
 0x141   :  { %2983 = vst [vmem:[#allocation41_spill] sm:$0xff] %v2249_v60  ;;  %376 = vmatmul.mubr.f32.vlgmr.msra.gmra.mxu0 %v2249_v60  ;;  %447 = vmatmul.mubr.f32.vlgmr.msra.gmra.mxu1 %v2249_v60  ;;  %v2999_v60 = vld [vmem:[#allocation32_spill] sm:$0xff] }
 0x142   :  { %486 = vmatpush1.msra.mxu0 %v1976_v2  ;;  %557 = vmatpush1.msra.mxu1 %v2001_v11 }
 0x143   :  { %487 = vmatprep.subr.mxu0 %v1978_v3  ;;  %558 = vmatprep.subr.mxu1 %v2007_v13 }
 0x144   :  { %488 = vmatpush1.msra.mxu0 %v1981_v4  ;;  %559 = vmatpush1.msra.mxu1 %v2009_v14 }
 0x145   :  { %489 = vmatprep.subr.mxu0 %v1984_v5  ;;  %560 = vmatprep.subr.mxu1 %v2015_v16 }
 0x146   :  { %490 = vmatpush1.msra.mxu0 %v1987_v6  ;;  %561 = vmatpush1.msra.mxu1 %v2021_v18 }
 0x147   :  { %491 = vmatprep.subr.mxu0 %v1990_v7  ;;  %562 = vmatprep.subr.mxu1 %v2023_v19 }
 0x148   :  { %492 = vmatpush1.msra.mxu0 %v1993_v8  ;;  %563 = vmatpush1.msra.mxu1 %v2029_v21 }
 0x149   :  { %493 = vmatprep.subr.mxu0 %v1998_v10  ;;  %564 = vmatprep.subr.mxu1 %v2035_v23 }
 0x14a   :  { %494 = vmatpush1.msra.mxu0 %v2004_v12  ;;  %565 = vmatpush1.msra.mxu1 %v2041_v25 }
 0x14b   :  { %495 = vmatprep.subr.mxu0 %v2012_v15  ;;  %566 = vmatprep.subr.mxu1 %v2047_v27 }
 0x14c   :  { %496 = vmatpush1.msra.mxu0 %v2018_v17  ;;  %567 = vmatpush1.msra.mxu1 %v2053_v29 }
 0x14d   :  { %497 = vmatprep.subr.mxu0 %v2026_v20  ;;  %568 = vmatprep.subr.mxu1 %v2059_v31 }
 0x14e   :  { %498 = vmatpush1.msra.mxu0 %v2032_v22  ;;  %569 = vmatpush1.msra.mxu1 %v2065_v33 }
 0x14f   :  { %499 = vmatprep.subr.mxu0 %v2038_v24  ;;  %570 = vmatprep.subr.mxu1 %v2071_v36 }
 0x150   :  { %500 = vmatpush1.msra.mxu0 %v2044_v26  ;;  %571 = vmatpush1.msra.mxu1 %v2077_v38 }
 0x151   :  { %501 = vmatprep.subr.mxu0 %v2050_v28  ;;  %572 = vmatprep.subr.mxu1 %v2083_v40 }
 0x152   :  { %502 = vmatpush1.msra.mxu0 %v2056_v30  ;;  %573 = vmatpush1.msra.mxu1 %v2089_v42 }
 0x153   :  { %503 = vmatprep.subr.mxu0 %v2062_v32  ;;  %574 = vmatprep.subr.mxu1 %v2095_v44 }
 0x154   :  { %504 = vmatpush1.msra.mxu0 %v2068_v35  ;;  %575 = vmatpush1.msra.mxu1 %v2101_v46 }
 0x155   :  { %505 = vmatprep.subr.mxu0 %v2074_v37  ;;  %576 = vmatprep.subr.mxu1 %v2107_v48 }
 0x156   :  { %506 = vmatpush1.msra.mxu0 %v2080_v39  ;;  %577 = vmatpush1.msra.mxu1 %v2113_v50 }
 0x157   :  { %507 = vmatprep.subr.mxu0 %v2086_v41  ;;  %578 = vmatprep.subr.mxu1 %v2119_v52 }
 0x158   :  { %508 = vmatpush1.msra.mxu0 %v2092_v43  ;;  %579 = vmatpush1.msra.mxu1 %v2984_v45 }
 0x159   :  { %509 = vmatprep.subr.mxu0 %v2985_v54  ;;  %580 = vmatprep.subr.mxu1 %v2986_v56 }
 0x15a   :  { %510 = vmatpush1.msra.mxu0 %v2987_v57  ;;  %581 = vmatpush1.msra.mxu1 %v2988_v58 }
 0x15b   :  { %511 = vmatprep.subr.mxu0 %v2989_v59  ;;  %582 = vmatprep.subr.mxu1 %v2990_v61  ;;  %v3000_v59 = vmov 0.0   ;;  %v3001_v61 = vld [vmem:[#allocation38_spill] sm:$0xff] }
 0x15c   :  { %512 = vmatpush1.msra.mxu0 %v2991_v63  ;;  %583 = vmatpush1.msra.mxu1 %v2992_v34  ;;  %v3002_v34 = vld [vmem:[#allocation17_spill] sm:$0xff]  ;;  %v3005_v63 = vld [vmem:[#allocation40_spill] sm:$0xff] }
 0x15d   :  { %513 = vmatprep.subr.mxu0 %v2993_v53  ;;  %584 = vmatprep.subr.mxu1 %v2994_v0  ;;  %v3003_v53 = vld [vmem:[#allocation18_spill] sm:$0xff]  ;;  %v3004_v0 = vld [vmem:[#allocation39_spill] sm:$0xff] }
 0x15e   :  { %514 = vmatpush1.msra.mxu0 %v2995_v49  ;;  %585 = vmatpush1.msra.mxu1 %v2996_v62  ;;  %v303_v49 = vrot.slane %v3004_v0, 1  ;;  %v304_v62 = vrot.slane %v3005_v63, 1 }
 0x15f   :  { %515 = vmatprep.subr.mxu0 %v2997_v47  ;;  %586 = vmatprep.subr.mxu1 %v2998_v55 }
 0x160   :  { %516 = vmatpush1.msra.mxu0 %v2999_v60  ;;  %549 = vmatprep.mubr.f32.mxu0 %v3000_v59 }
 0x161   :  { %587 = vmatpush1.msra.mxu1 %v3001_v61  ;;  %620 = vmatprep.mubr.f32.mxu1 %v3000_v59  ;;  %v306_v61 = vrot.slane %v2240_v1, 1 }
 0x162   :  { %659 = vmatprep.subr.mxu0 %v3002_v34  ;;  %730 = vmatprep.subr.mxu1 %v3003_v53  ;;  %v305_v34 = vrot.slane %v2242_v51, 1 }
 0x201   :  { %v377_v58 = vpop.f32.mrf.mxu0  ;;  %v448_v60 = vpop.f32.mrf.mxu1 }
 0x202   :  { %v378_v47 = vadd.f32 %v377_v58, %v303_v49  ;;  %v449_v0 = vadd.f32 %v448_v60, %v305_v34  ;;  %v3009_v34 = vld [vmem:[#allocation21_spill] sm:$0xff] }
 0x203   :  { %v379_v57 = vpop.f32.mrf.mxu0  ;;  %v450_v59 = vpop.f32.mrf.mxu1 }
 0x204   :  { %v1597_v55 = vmul.f32 -1.442695, %v378_v47  ;;  %v380_v56 = vadd.f32 %v379_v57, %v304_v62  ;;  %v451_v45 = vadd.f32 %v450_v59, %v306_v61 }
 0x206   :  { %1642 = vpow2.f32 %v1597_v55  ;;  %v1598_v54 = vmul.f32 -1.442695, %v380_v56  ;;  %v1599_v53 = vmul.f32 -1.442695, %v451_v45  ;;  %v3012_v55 = vld [vmem:[#allocation31_spill] sm:$0xff] }
 0x208   :  { %1644 = vpow2.f32 %v1598_v54 }
 0x209   :  { %1646 = vpow2.f32 %v1599_v53  ;;  %v3010_v53 = vld [vmem:[#allocation29_spill] sm:$0xff] }
 0x213   :  { %v1643_v43 = vpop.eup %1642 }
 0x214   :  { %v456_v52 = vadd.f32 1.0, %v1643_v43 }
 0x215   :  { %v1645_v63 = vpop.eup %1644 }
 0x216   :  { %1648 = vrcp.f32 %v456_v52  ;;  %v462_v58 = vadd.f32 1.0, %v1645_v63  ;;  %v1647_v57 = vpop.eup %1646  ;;  %v3006_v52 = vld [vmem:[#allocation25_spill] sm:$0xff]  ;;  %v3008_v63 = vld [vmem:[#allocation27_spill] sm:$0xff] }
 0x217   :  { %1650 = vtanh.f32 %v449_v0  ;;  %v469_v62 = vadd.f32 1.0, %v1647_v57  ;;  %v3011_v0 = vld [vmem:[#allocation22_spill] sm:$0xff]  ;;  %v3014_v57 = vld [vmem:[#allocation33_spill] sm:$0xff] }
 0x218   :  { %1652 = vrcp.f32 %v462_v58  ;;  %v3013_v58 = vld [vmem:[#allocation23_spill] sm:$0xff] }
 0x219   :  { %1654 = vrcp.f32 %v469_v62  ;;  %v3018_v62 = vld [vmem:[#allocation35_spill] sm:$0xff] }
 0x223   :  { %v1649_v49 = vpop.eup %1648 }
 0x224   :  { %v1651_v56 = vpop.eup %1650 }
 0x225   :  { %v1653_v54 = vpop.eup %1652  ;;  %v473_v47 = vmul.f32 %v1651_v56, %v1649_v49  ;;  %v3015_v49 = vld [vmem:[#allocation24_spill] sm:$0xff]  ;;  %v3016_v56 = vld [vmem:[#allocation34_spill] sm:$0xff] }
 0x226   :  { %v472_v59 = vmul.f32 %v1653_v54, %v2246_v9  ;;  %v1655_v43 = vpop.eup %1654  ;;  %v3007_v9 = vld [vmem:[#allocation20_spill] sm:$0xff]  ;;  %v3017_v54 = vld [vmem:[#allocation26_spill] sm:$0xff] }
 0x228   :  { %v2324_v61 = vadd.f32 %v473_v47, %v472_v59  ;;  %v3019_v47 = vld [vmem:[#allocation28_spill] sm:$0xff] }
 0x229   :  { %v3020_v59 = vld [vmem:[#allocation36_spill] sm:$0xff] }
 0x22a   :  { %1656 = vtanh.f32 %v2324_v61 }
 0x237   :  { %v1657_v60 = vpop.eup %1656 }
 0x238   :  { %v2327_v45 = vmul.f32 %v1657_v60, %v1655_v43  ;;  %v3021_v43 = vld [vmem:[#allocation30_spill] sm:$0xff]  ;;  %v3022_v60 = vld [vmem:[#allocation37_spill] sm:$0xff] }
 0x23a   :  { %550 = vmatmul.mubr.f32.vlgmr.msra.gmra.mxu0 %v2327_v45  ;;  %621 = vmatmul.mubr.f32.vlgmr.msra.gmra.mxu1 %v2327_v45 }
 0x23b   :  { %660 = vmatpush1.msra.mxu0 %v1976_v2  ;;  %731 = vmatpush1.msra.mxu1 %v2001_v11 }
 0x23c   :  { %661 = vmatprep.subr.mxu0 %v1978_v3  ;;  %732 = vmatprep.subr.mxu1 %v2007_v13 }
 0x23d   :  { %662 = vmatpush1.msra.mxu0 %v1981_v4  ;;  %733 = vmatpush1.msra.mxu1 %v2009_v14 }
 0x23e   :  { %663 = vmatprep.subr.mxu0 %v1984_v5  ;;  %734 = vmatprep.subr.mxu1 %v2015_v16 }
 0x23f   :  { %664 = vmatpush1.msra.mxu0 %v1987_v6  ;;  %735 = vmatpush1.msra.mxu1 %v2021_v18 }
 0x240   :  { %665 = vmatprep.subr.mxu0 %v1990_v7  ;;  %736 = vmatprep.subr.mxu1 %v2023_v19 }
 0x241   :  { %666 = vmatpush1.msra.mxu0 %v1993_v8  ;;  %737 = vmatpush1.msra.mxu1 %v2029_v21 }
 0x242   :  { %667 = vmatprep.subr.mxu0 %v1998_v10  ;;  %738 = vmatprep.subr.mxu1 %v2035_v23 }
 0x243   :  { %668 = vmatpush1.msra.mxu0 %v2004_v12  ;;  %739 = vmatpush1.msra.mxu1 %v2041_v25 }
 0x244   :  { %669 = vmatprep.subr.mxu0 %v2012_v15  ;;  %740 = vmatprep.subr.mxu1 %v2047_v27 }
 0x245   :  { %670 = vmatpush1.msra.mxu0 %v2018_v17  ;;  %741 = vmatpush1.msra.mxu1 %v2053_v29 }
 0x246   :  { %671 = vmatprep.subr.mxu0 %v2026_v20  ;;  %742 = vmatprep.subr.mxu1 %v2059_v31 }
 0x247   :  { %672 = vmatpush1.msra.mxu0 %v2032_v22  ;;  %743 = vmatpush1.msra.mxu1 %v2065_v33 }
 0x248   :  { %673 = vmatprep.subr.mxu0 %v2038_v24  ;;  %744 = vmatprep.subr.mxu1 %v2071_v36 }
 0x249   :  { %674 = vmatpush1.msra.mxu0 %v2044_v26  ;;  %745 = vmatpush1.msra.mxu1 %v2077_v38 }
 0x24a   :  { %675 = vmatprep.subr.mxu0 %v2050_v28  ;;  %746 = vmatprep.subr.mxu1 %v2083_v40 }
 0x24b   :  { %676 = vmatpush1.msra.mxu0 %v2056_v30  ;;  %747 = vmatpush1.msra.mxu1 %v2089_v42 }
 0x24c   :  { %677 = vmatprep.subr.mxu0 %v2062_v32  ;;  %748 = vmatprep.subr.mxu1 %v2095_v44 }
 0x24d   :  { %678 = vmatpush1.msra.mxu0 %v2068_v35  ;;  %749 = vmatpush1.msra.mxu1 %v2101_v46 }
 0x24e   :  { %679 = vmatprep.subr.mxu0 %v2074_v37  ;;  %750 = vmatprep.subr.mxu1 %v2107_v48 }
 0x24f   :  { %680 = vmatpush1.msra.mxu0 %v2080_v39  ;;  %751 = vmatpush1.msra.mxu1 %v2113_v50 }
 0x250   :  { %681 = vmatprep.subr.mxu0 %v2086_v41  ;;  %752 = vmatprep.subr.mxu1 %v3006_v52 }
 0x251   :  { %682 = vmatpush1.msra.mxu0 %v3007_v9  ;;  %753 = vmatpush1.msra.mxu1 %v3008_v63 }
 0x252   :  { %683 = vmatprep.subr.mxu0 %v3009_v34  ;;  %754 = vmatprep.subr.mxu1 %v3010_v53 }
 0x253   :  { %684 = vmatpush1.msra.mxu0 %v3011_v0  ;;  %755 = vmatpush1.msra.mxu1 %v3012_v55  ;;  %v3023_v55 = vld [vmem:[#allocation32_spill] sm:$0xff] }
 0x254   :  { %685 = vmatprep.subr.mxu0 %v3013_v58  ;;  %756 = vmatprep.subr.mxu1 %v3014_v57  ;;  %v3024_v58 = vmov 0.0   ;;  %v3025_v57 = vld [vmem:[#allocation38_spill] sm:$0xff] }
 0x255   :  { %686 = vmatpush1.msra.mxu0 %v3015_v49  ;;  %757 = vmatpush1.msra.mxu1 %v3016_v56  ;;  %v3026_v56 = vld [vmem:[#allocation17_spill] sm:$0xff]  ;;  %v3029_v49 = vld [vmem:[#allocation40_spill] sm:$0xff] }
 0x256   :  { %687 = vmatprep.subr.mxu0 %v3017_v54  ;;  %758 = vmatprep.subr.mxu1 %v3018_v62  ;;  %v3027_v54 = vld [vmem:[#allocation18_spill] sm:$0xff]  ;;  %v3028_v62 = vld [vmem:[#allocation39_spill] sm:$0xff] }
 0x257   :  { %688 = vmatpush1.msra.mxu0 %v3019_v47  ;;  %759 = vmatpush1.msra.mxu1 %v3020_v59  ;;  %v477_v47 = vrot.slane %v3028_v62, 2  ;;  %v478_v59 = vrot.slane %v3029_v49, 2 }
 0x258   :  { %689 = vmatprep.subr.mxu0 %v3021_v43  ;;  %760 = vmatprep.subr.mxu1 %v3022_v60 }
 0x259   :  { %690 = vmatpush1.msra.mxu0 %v3023_v55  ;;  %723 = vmatprep.mubr.f32.mxu0 %v3024_v58 }
 0x25a   :  { %761 = vmatpush1.msra.mxu1 %v3025_v57  ;;  %794 = vmatprep.mubr.f32.mxu1 %v3024_v58  ;;  %v480_v57 = vrot.slane %v2240_v1, 2 }
 0x25b   :  { %833 = vmatprep.subr.mxu0 %v3026_v56  ;;  %904 = vmatprep.subr.mxu1 %v3027_v54  ;;  %v479_v56 = vrot.slane %v2242_v51, 2 }
 0x2fa   :  { %v551_v0 = vpop.f32.mrf.mxu0  ;;  %v622_v55 = vpop.f32.mrf.mxu1 }
 0x2fb   :  { %v552_v43 = vadd.f32 %v551_v0, %v477_v47  ;;  %v623_v62 = vadd.f32 %v622_v55, %v479_v56 }
 0x2fc   :  { %v553_v53 = vpop.f32.mrf.mxu0  ;;  %v624_v58 = vpop.f32.mrf.mxu1 }
 0x2fd   :  { %v1600_v60 = vmul.f32 -1.442695, %v552_v43  ;;  %v554_v34 = vadd.f32 %v553_v53, %v478_v59  ;;  %v625_v9 = vadd.f32 %v624_v58, %v480_v57 }
 0x2ff   :  { %1658 = vpow2.f32 %v1600_v60  ;;  %v1601_v63 = vmul.f32 -1.442695, %v554_v34  ;;  %v1602_v54 = vmul.f32 -1.442695, %v625_v9 }
 0x301   :  { %1660 = vpow2.f32 %v1601_v63 }
 0x302   :  { %1662 = vpow2.f32 %v1602_v54 }
 0x30c   :  { %v1659_v52 = vpop.eup %1658 }
 0x30d   :  { %v630_v41 = vadd.f32 1.0, %v1659_v52 }
 0x30e   :  { %v1661_v49 = vpop.eup %1660 }
 0x30f   :  { %1664 = vrcp.f32 %v630_v41  ;;  %v636_v0 = vadd.f32 1.0, %v1661_v49  ;;  %v1663_v53 = vpop.eup %1662  ;;  %v1522_v41 = vrot.slane %v2327_v45, 7 }
 0x310   :  { %1666 = vtanh.f32 %v623_v62  ;;  %v643_v59 = vadd.f32 1.0, %v1663_v53 }
 0x311   :  { %1668 = vrcp.f32 %v636_v0 }
 0x312   :  { %1670 = vrcp.f32 %v643_v59 }
 0x31c   :  { %v1665_v47 = vpop.eup %1664 }
 0x31d   :  { %v1667_v34 = vpop.eup %1666 }
 0x31e   :  { %v1669_v63 = vpop.eup %1668  ;;  %v647_v43 = vmul.f32 %v1667_v34, %v1665_v47 }
 0x31f   :  { %v646_v58 = vmul.f32 %v1669_v63, %v2324_v61  ;;  %v1671_v52 = vpop.eup %1670  ;;  %v3030_v61 = vld [vmem:[#allocation41_spill] sm:$0xff] }
 0x320   :  { %v1543_v62 = vsel %vm1542_vm0, %v3030_v61, %v1522_v41  ;;  %v2496_v61 = vld [vmem:[#allocation9 + $0x1d8] sm:$0xff] }
 0x321   :  { %v2402_v57 = vadd.f32 %v647_v43, %v646_v58 }
 0x323   :  { %1672 = vtanh.f32 %v2402_v57 }
 0x330   :  { %v1673_v9 = vpop.eup %1672 }
 0x331   :  { %v650_v55 = vmul.f32 %v1673_v9, %v1671_v52 }
 0x333   :  { %724 = vmatmul.mubr.f32.vlgmr.msra.gmra.mxu0 %v650_v55  ;;  %v1525_v49 = vrot.slane %v650_v55, 6  ;;  %795 = vmatmul.mubr.f32.vlgmr.msra.gmra.mxu1 %v650_v55  ;;  %v2487_v55 = vld [vmem:[#allocation9 + $0x1e0] sm:$0xff] }
 0x334   :  { %834 = vmatpush1.msra.mxu0 %v1976_v2  ;;  %905 = vmatpush1.msra.mxu1 %v2001_v11  ;;  %v3031_v2 = vld [vmem:[#allocation19_spill] sm:$0xff] }
 0x335   :  { %835 = vmatprep.subr.mxu0 %v1978_v3  ;;  %906 = vmatprep.subr.mxu1 %v2007_v13  ;;  %v2411_v60 = vsel %vm1544_vm1, %v1543_v62, %v1525_v49  ;;  %v3032_v3 = vld [vmem:[#allocation25_spill] sm:$0xff]  ;;  %v3039_v11 = vld [vmem:[#allocation23_spill] sm:$0xff]  ;;  %v3041_v13 = vld [vmem:[#allocation24_spill] sm:$0xff] }
 0x336   :  { %836 = vmatpush1.msra.mxu0 %v1981_v4  ;;  %907 = vmatpush1.msra.mxu1 %v2009_v14  ;;  %v3033_v4 = vld [vmem:[#allocation20_spill] sm:$0xff]  ;;  %v3042_v14 = vld [vmem:[#allocation34_spill] sm:$0xff] }
 0x337   :  { %837 = vmatprep.subr.mxu0 %v1984_v5  ;;  %908 = vmatprep.subr.mxu1 %v2015_v16  ;;  %v3034_v5 = vld [vmem:[#allocation27_spill] sm:$0xff]  ;;  %v2490_v49 = vld [vmem:[#allocation9 + $0x1f0] sm:$0xff] }
 0x338   :  { %838 = vmatpush1.msra.mxu0 %v1987_v6  ;;  %909 = vmatpush1.msra.mxu1 %v2021_v18  ;;  %v3035_v6 = vld [vmem:[#allocation21_spill] sm:$0xff]  ;;  %v3044_v16 = vld [vmem:[#allocation35_spill] sm:$0xff]  ;;  %v3046_v18 = vld [vmem:[#allocation36_spill] sm:$0xff] }
 0x339   :  { %839 = vmatprep.subr.mxu0 %v1990_v7  ;;  %910 = vmatprep.subr.mxu1 %v2023_v19  ;;  %v3036_v7 = vld [vmem:[#allocation29_spill] sm:$0xff]  ;;  %v3047_v19 = vld [vmem:[#allocation30_spill] sm:$0xff] }
 0x33a   :  { %840 = vmatpush1.msra.mxu0 %v1993_v8  ;;  %911 = vmatpush1.msra.mxu1 %v2029_v21  ;;  %v3037_v8 = vld [vmem:[#allocation22_spill] sm:$0xff]  ;;  %v3049_v21 = vld [vmem:[#allocation32_spill] sm:$0xff] }
 0x33b   :  { %841 = vmatprep.subr.mxu0 %v1998_v10  ;;  %912 = vmatprep.subr.mxu1 %v2035_v23  ;;  %v3038_v10 = vld [vmem:[#allocation31_spill] sm:$0xff]  ;;  %v3051_v23 = vld [vmem:[#allocation38_spill] sm:$0xff] }
 0x33c   :  { %842 = vmatpush1.msra.mxu0 %v2004_v12  ;;  %913 = vmatpush1.msra.mxu1 %v2041_v25  ;;  %v3040_v12 = vld [vmem:[#allocation33_spill] sm:$0xff]  ;;  %v2476_v25 = vld [vmem:[#allocation9 + $0x1f8] sm:$0xff] }
 0x33d   :  { %843 = vmatprep.subr.mxu0 %v2012_v15  ;;  %914 = vmatprep.subr.mxu1 %v2047_v27  ;;  %v3043_v15 = vld [vmem:[#allocation26_spill] sm:$0xff]  ;;  %3053 = vst [vmem:[#allocation18_spill] sm:$0xff] %v2476_v25 }
 0x33e   :  { %844 = vmatpush1.msra.mxu0 %v2018_v17  ;;  %915 = vmatpush1.msra.mxu1 %v2053_v29  ;;  %v3045_v17 = vld [vmem:[#allocation28_spill] sm:$0xff] }
 0x33f   :  { %845 = vmatprep.subr.mxu0 %v2026_v20  ;;  %916 = vmatprep.subr.mxu1 %v2059_v31  ;;  %v3048_v20 = vld [vmem:[#allocation37_spill] sm:$0xff] }
 0x340   :  { %846 = vmatpush1.msra.mxu0 %v2032_v22  ;;  %917 = vmatpush1.msra.mxu1 %v2065_v33  ;;  %v3050_v22 = vmov 0.0  }
 0x341   :  { %847 = vmatprep.subr.mxu0 %v2038_v24  ;;  %918 = vmatprep.subr.mxu1 %v2071_v36  ;;  %v2473_v24 = vld [vmem:[#allocation9 + $0x1e8] sm:$0xff] }
 0x342   :  { %848 = vmatpush1.msra.mxu0 %v2044_v26  ;;  %919 = vmatpush1.msra.mxu1 %v2077_v38  ;;  %3052 = vst [vmem:[#allocation17_spill] sm:$0xff] %v2473_v24  ;;  %v3054_v26 = vld [vmem:[#allocation39_spill] sm:$0xff]  ;;  %v654_v38 = vrot.slane %v2240_v1, 3 }
 0x343   :  { %849 = vmatprep.subr.mxu0 %v2050_v28  ;;  %920 = vmatprep.subr.mxu1 %v2083_v40  ;;  %v651_v27 = vrot.slane %v3054_v26, 3  ;;  %v3055_v28 = vld [vmem:[#allocation40_spill] sm:$0xff] }
 0x344   :  { %850 = vmatpush1.msra.mxu0 %v2056_v30  ;;  %921 = vmatpush1.msra.mxu1 %v2089_v42  ;;  %v652_v29 = vrot.slane %v3055_v28, 3  ;;  %v653_v42 = vrot.slane %v2242_v51, 3 }
 0x345   :  { %851 = vmatprep.subr.mxu0 %v2062_v32  ;;  %922 = vmatprep.subr.mxu1 %v2095_v44 }
 0x346   :  { %852 = vmatpush1.msra.mxu0 %v2068_v35  ;;  %923 = vmatpush1.msra.mxu1 %v2101_v46 }
 0x347   :  { %853 = vmatprep.subr.mxu0 %v2074_v37  ;;  %924 = vmatprep.subr.mxu1 %v2107_v48 }
 0x348   :  { %854 = vmatpush1.msra.mxu0 %v2080_v39  ;;  %925 = vmatpush1.msra.mxu1 %v2113_v50 }
 0x349   :  { %855 = vmatprep.subr.mxu0 %v3031_v2  ;;  %926 = vmatprep.subr.mxu1 %v3032_v3  ;;  %v2502_v2 = vld [vmem:[#allocation9 + $0x1c0] sm:$0xff]  ;;  %v2505_v3 = vld [vmem:[#allocation9 + $0x1d0] sm:$0xff] }
 0x34a   :  { %856 = vmatpush1.msra.mxu0 %v3033_v4  ;;  %927 = vmatpush1.msra.mxu1 %v3034_v5  ;;  %v2508_v4 = vld [vmem:[#allocation9 + $0x1a8] sm:$0xff]  ;;  %v2511_v5 = vld [vmem:[#allocation9 + $0x1b8] sm:$0xff] }
 0x34b   :  { %857 = vmatprep.subr.mxu0 %v3035_v6  ;;  %928 = vmatprep.subr.mxu1 %v3036_v7  ;;  %v2514_v6 = vld [vmem:[#allocation9 + $0x1a0] sm:$0xff]  ;;  %v2520_v7 = vld [vmem:[#allocation9 + $0x188] sm:$0xff] }
 0x34c   :  { %858 = vmatpush1.msra.mxu0 %v3037_v8  ;;  %929 = vmatpush1.msra.mxu1 %v3038_v10  ;;  %v2523_v8 = vld [vmem:[#allocation9 + $0x198] sm:$0xff] }
 0x34d   :  { %859 = vmatprep.subr.mxu0 %v3039_v11  ;;  %930 = vmatprep.subr.mxu1 %v3040_v12  ;;  %v2526_v11 = vld [vmem:[#allocation9 + $0x180] sm:$0xff] }
 0x34e   :  { %860 = vmatpush1.msra.mxu0 %v3041_v13  ;;  %931 = vmatpush1.msra.mxu1 %v3042_v14  ;;  %v2529_v13 = vld [vmem:[#allocation9 + $0x190] sm:$0xff] }
 0x34f   :  { %861 = vmatprep.subr.mxu0 %v3043_v15  ;;  %932 = vmatprep.subr.mxu1 %v3044_v16  ;;  %v2532_v15 = vld [vmem:[#allocation9 + $0x168] sm:$0xff] }
 0x350   :  { %862 = vmatpush1.msra.mxu0 %v3045_v17  ;;  %933 = vmatpush1.msra.mxu1 %v3046_v18  ;;  %v2535_v17 = vld [vmem:[#allocation9 + $0x178] sm:$0xff] }
 0x351   :  { %863 = vmatprep.subr.mxu0 %v3047_v19  ;;  %934 = vmatprep.subr.mxu1 %v3048_v20  ;;  %v2538_v19 = vld [vmem:[#allocation9 + $0x160] sm:$0xff] }
 0x352   :  { %864 = vmatpush1.msra.mxu0 %v3049_v21  ;;  %897 = vmatprep.mubr.f32.mxu0 %v3050_v22  ;;  %v2541_v21 = vld [vmem:[#allocation9 + $0x170] sm:$0xff] }
 0x353   :  { %935 = vmatpush1.msra.mxu1 %v3051_v23  ;;  %968 = vmatprep.mubr.f32.mxu1 %v3050_v22 }
 0x354   :  { %1007 = vmatprep.subr.mxu0 %v2473_v24  ;;  %1078 = vmatprep.subr.mxu1 %v2476_v25 }
 0x3f3   :  { %v725_v30 = vpop.f32.mrf.mxu0  ;;  %v796_v36 = vpop.f32.mrf.mxu1 }
 0x3f4   :  { %v726_v31 = vadd.f32 %v725_v30, %v651_v27  ;;  %v797_v48 = vadd.f32 %v796_v36, %v653_v42  ;;  %v2544_v27 = vld [vmem:[#allocation9 + $0x148] sm:$0xff]  ;;  %v2550_v30 = vld [vmem:[#allocation9 + $0x140] sm:$0xff]  ;;  %v2565_v36 = vld [vmem:[#allocation9 + $0x130] sm:$0xff] }
 0x3f5   :  { %v727_v32 = vpop.f32.mrf.mxu0  ;;  %v798_v39 = vpop.f32.mrf.mxu1  ;;  %v2580_v42 = vld [vmem:[#allocation9 + $0xe8] sm:$0xff] }
 0x3f6   :  { %v1603_v33 = vmul.f32 -1.442695, %v726_v31  ;;  %v728_v35 = vadd.f32 %v727_v32, %v652_v29  ;;  %v799_v40 = vadd.f32 %v798_v39, %v654_v38  ;;  %v2547_v29 = vld [vmem:[#allocation9 + $0x158] sm:$0xff]  ;;  %v2553_v31 = vld [vmem:[#allocation9 + $0x150] sm:$0xff]  ;;  %v2556_v32 = vld [vmem:[#allocation9 + $0x128] sm:$0xff] }
 0x3f7   :  { %v2571_v38 = vld [vmem:[#allocation9 + $0x118] sm:$0xff]  ;;  %v2574_v39 = vld [vmem:[#allocation9 + $0x100] sm:$0xff] }
 0x3f8   :  { %1674 = vpow2.f32 %v1603_v33  ;;  %v1604_v37 = vmul.f32 -1.442695, %v728_v35  ;;  %v1605_v44 = vmul.f32 -1.442695, %v799_v40  ;;  %v2559_v33 = vld [vmem:[#allocation9 + $0x138] sm:$0xff]  ;;  %v2562_v35 = vld [vmem:[#allocation9 + $0x120] sm:$0xff] }
 0x3f9   :  { %v2577_v40 = vld [vmem:[#allocation9 + $0x110] sm:$0xff] }
 0x3fa   :  { %1676 = vpow2.f32 %v1604_v37  ;;  %v2568_v37 = vld [vmem:[#allocation9 + $0x108] sm:$0xff] }
 0x3fb   :  { %1678 = vpow2.f32 %v1605_v44  ;;  %v2583_v44 = vld [vmem:[#allocation9 + $0xf8] sm:$0xff] }
 0x405   :  { %v1675_v46 = vpop.eup %1674 }
 0x406   :  { %v804_v50 = vadd.f32 1.0, %v1675_v46  ;;  %v2586_v46 = vld [vmem:[#allocation9 + $0xe0] sm:$0xff] }
 0x407   :  { %v1677_v45 = vpop.eup %1676 }
 0x408   :  { %1680 = vrcp.f32 %v804_v50  ;;  %v810_v56 = vadd.f32 1.0, %v1677_v45  ;;  %v1679_v54 = vpop.eup %1678  ;;  %v2592_v50 = vld [vmem:[#allocation9 + $0xc8] sm:$0xff]  ;;  %v2595_v45 = vld [vmem:[#allocation9 + $0xd8] sm:$0xff] }
 0x409   :  { %1682 = vtanh.f32 %v797_v48  ;;  %v817_v34 = vadd.f32 1.0, %v1679_v54  ;;  %v2589_v48 = vld [vmem:[#allocation9 + $0xf0] sm:$0xff] }
 0x40a   :  { %1684 = vrcp.f32 %v810_v56  ;;  %v2598_v56 = vld [vmem:[#allocation9 + $0xc0] sm:$0xff]  ;;  %v2601_v54 = vld [vmem:[#allocation9 + $0xd0] sm:$0xff] }
 0x40b   :  { %1686 = vrcp.f32 %v817_v34  ;;  %v2613_v34 = vld [vmem:[#allocation9 + $0xb0] sm:$0xff] }
 0x415   :  { %v1681_v0 = vpop.eup %1680 }
 0x416   :  { %v1683_v53 = vpop.eup %1682 }
 0x417   :  { %v1685_v47 = vpop.eup %1684  ;;  %v821_v63 = vmul.f32 %v1683_v53, %v1681_v0  ;;  %v2604_v0 = vld [vmem:[#allocation9 + $0xa8] sm:$0xff]  ;;  %v2607_v53 = vld [vmem:[#allocation9 + $0xb8] sm:$0xff] }
 0x418   :  { %v820_v59 = vmul.f32 %v1685_v47, %v2402_v57  ;;  %v1687_v58 = vpop.eup %1686  ;;  %v2493_v57 = vld [vmem:[#allocation9 + $0x1c8] sm:$0xff]  ;;  %v2610_v47 = vld [vmem:[#allocation9 + $0xa0] sm:$0xff] }
 0x41a   :  { %v2484_v43 = vadd.f32 %v821_v63, %v820_v59  ;;  %v2616_v63 = vld [vmem:[#allocation9 + $0x88] sm:$0xff]  ;;  %v2619_v59 = vld [vmem:[#allocation9 + $0x98] sm:$0xff] }
 0x41b   :  { %3056 = vst [vmem:[#allocation41_spill] sm:$0xff] %v2616_v63  ;;  %3057 = vst [vmem:[#allocation19_spill] sm:$0xff] %v2619_v59 }
 0x41c   :  { %1688 = vtanh.f32 %v2484_v43 }
 0x429   :  { %v1689_v52 = vpop.eup %1688 }
 0x42a   :  { %v824_v9 = vmul.f32 %v1689_v52, %v1687_v58  ;;  %v2622_v58 = vld [vmem:[#allocation9 + $0x80] sm:$0xff]  ;;  %v2625_v52 = vld [vmem:[#allocation9 + $0x90] sm:$0xff] }
 0x42b   :  { %3058 = vst [vmem:[#allocation25_spill] sm:$0xff] %v2622_v58  ;;  %3059 = vst [vmem:[#allocation20_spill] sm:$0xff] %v2625_v52 }
 0x42c   :  { %898 = vmatmul.mubr.f32.vlgmr.msra.gmra.mxu0 %v824_v9  ;;  %v1528_v41 = vrot.slane %v824_v9, 5  ;;  %969 = vmatmul.mubr.f32.vlgmr.msra.gmra.mxu1 %v824_v9  ;;  %v2628_v9 = vld [vmem:[#allocation9 + $0x68] sm:$0xff] }
 0x42d   :  { %1008 = vmatpush1.msra.mxu0 %v2487_v55  ;;  %1079 = vmatpush1.msra.mxu1 %v2490_v49  ;;  %3060 = vst [vmem:[#allocation27_spill] sm:$0xff] %v2628_v9 }
 0x42e   :  { %1009 = vmatprep.subr.mxu0 %v2493_v57  ;;  %1080 = vmatprep.subr.mxu1 %v2496_v61  ;;  %v2500_v62 = vsel %vm1546_vm2, %v2411_v60, %v1528_v41  ;;  %v2517_v60 = vld [vmem:[#allocation9 + $0x1b0] sm:$0xff]  ;;  %v2631_v41 = vld [vmem:[#allocation9 + $0x78] sm:$0xff] }
 0x42f   :  { %1010 = vmatpush1.msra.mxu0 %v2502_v2  ;;  %1081 = vmatpush1.msra.mxu1 %v2505_v3  ;;  %3061 = vst [vmem:[#allocation21_spill] sm:$0xff] %v2631_v41 }
 0x430   :  { %1011 = vmatprep.subr.mxu0 %v2508_v4  ;;  %1082 = vmatprep.subr.mxu1 %v2511_v5 }
 0x431   :  { %1012 = vmatpush1.msra.mxu0 %v2514_v6  ;;  %1083 = vmatpush1.msra.mxu1 %v2517_v60 }
 0x432   :  { %1013 = vmatprep.subr.mxu0 %v2520_v7  ;;  %1084 = vmatprep.subr.mxu1 %v2523_v8 }
 0x433   :  { %1014 = vmatpush1.msra.mxu0 %v2526_v11  ;;  %1085 = vmatpush1.msra.mxu1 %v2529_v13 }
 0x434   :  { %1015 = vmatprep.subr.mxu0 %v2532_v15  ;;  %1086 = vmatprep.subr.mxu1 %v2535_v17 }
 0x435   :  { %1016 = vmatpush1.msra.mxu0 %v2538_v19  ;;  %1087 = vmatpush1.msra.mxu1 %v2541_v21 }
 0x436   :  { %1017 = vmatprep.subr.mxu0 %v2544_v27  ;;  %1088 = vmatprep.subr.mxu1 %v2547_v29 }
 0x437   :  { %1018 = vmatpush1.msra.mxu0 %v2550_v30  ;;  %1089 = vmatpush1.msra.mxu1 %v2553_v31 }
 0x438   :  { %1019 = vmatprep.subr.mxu0 %v2556_v32  ;;  %1090 = vmatprep.subr.mxu1 %v2559_v33 }
 0x439   :  { %1020 = vmatpush1.msra.mxu0 %v2562_v35  ;;  %1091 = vmatpush1.msra.mxu1 %v2565_v36 }
 0x43a   :  { %1021 = vmatprep.subr.mxu0 %v2568_v37  ;;  %1092 = vmatprep.subr.mxu1 %v2571_v38 }
 0x43b   :  { %1022 = vmatpush1.msra.mxu0 %v2574_v39  ;;  %1093 = vmatpush1.msra.mxu1 %v2577_v40 }
 0x43c   :  { %1023 = vmatprep.subr.mxu0 %v2580_v42  ;;  %1094 = vmatprep.subr.mxu1 %v2583_v44 }
 0x43d   :  { %1024 = vmatpush1.msra.mxu0 %v2586_v46  ;;  %1095 = vmatpush1.msra.mxu1 %v2589_v48 }
 0x43e   :  { %1025 = vmatprep.subr.mxu0 %v2592_v50  ;;  %1096 = vmatprep.subr.mxu1 %v2595_v45 }
 0x43f   :  { %1026 = vmatpush1.msra.mxu0 %v2598_v56  ;;  %1097 = vmatpush1.msra.mxu1 %v2601_v54 }
 0x440   :  { %1027 = vmatprep.subr.mxu0 %v2604_v0  ;;  %1098 = vmatprep.subr.mxu1 %v2607_v53 }
 0x441   :  { %1028 = vmatpush1.msra.mxu0 %v2610_v47  ;;  %1099 = vmatpush1.msra.mxu1 %v2613_v34 }
 0x442   :  { %1029 = vmatprep.subr.mxu0 %v2616_v63  ;;  %1100 = vmatprep.subr.mxu1 %v2619_v59  ;;  %v2634_v63 = vld [vmem:[#allocation9 + $0x60] sm:$0xff]  ;;  %v2638_v59 = vld [vmem:[#allocation9 + $0x48] sm:$0xff] }
 0x443   :  { %1030 = vmatpush1.msra.mxu0 %v2622_v58  ;;  %1101 = vmatpush1.msra.mxu1 %v2625_v52  ;;  %3062 = vst [vmem:[#allocation29_spill] sm:$0xff] %v2634_v63  ;;  %3063 = vst [vmem:[#allocation22_spill] sm:$0xff] %v2638_v59  ;;  %v2642_v52 = vld [vmem:[#allocation9 + $0x40] sm:$0xff] }
 0x444   :  { %1031 = vmatprep.subr.mxu0 %v2628_v9  ;;  %1102 = vmatprep.subr.mxu1 %v2631_v41  ;;  %3064 = vst [vmem:[#allocation31_spill] sm:$0xff] %v2642_v52  ;;  %v2646_v9 = vld [vmem:[#allocation9 + $0x28] sm:$0xff] }
 0x445   :  { %1032 = vmatpush1.msra.mxu0 %v2634_v63  ;;  %1103 = vmatpush1.msra.mxu1 %v3038_v10  ;;  %3065 = vst [vmem:[#allocation23_spill] sm:$0xff] %v2646_v9  ;;  %v2650_v63 = vld [vmem:[#allocation9 + $0x20] sm:$0xff]  ;;  %v2654_v10 = vld [vmem:[#allocation9 + $0x8] sm:$0xff] }
 0x446   :  { %1033 = vmatprep.subr.mxu0 %v2638_v59  ;;  %1104 = vmatprep.subr.mxu1 %v3040_v12  ;;  %3066 = vst [vmem:[#allocation33_spill] sm:$0xff] %v2650_v63  ;;  %3067 = vst [vmem:[#allocation24_spill] sm:$0xff] %v2654_v10  ;;  %v2658_v12 = vld [vmem:[#allocation9] sm:$0xff] }
 0x447   :  { %1034 = vmatpush1.msra.mxu0 %v2642_v52  ;;  %1105 = vmatpush1.msra.mxu1 %v3042_v14  ;;  %3068 = vst [vmem:[#allocation34_spill] sm:$0xff] %v2658_v12  ;;  %v825_v14 = vrot.slane %v3054_v26, 4 }
 0x448   :  { %1035 = vmatprep.subr.mxu0 %v2646_v9  ;;  %1106 = vmatprep.subr.mxu1 %v3044_v16  ;;  %v826_v16 = vrot.slane %v3055_v28, 4 }
 0x449   :  { %1036 = vmatpush1.msra.mxu0 %v2650_v63  ;;  %1107 = vmatpush1.msra.mxu1 %v3046_v18 }
 0x44a   :  { %1037 = vmatprep.subr.mxu0 %v2654_v10  ;;  %1108 = vmatprep.subr.mxu1 %v3048_v20 }
 0x44b   :  { %1038 = vmatpush1.msra.mxu0 %v2658_v12  ;;  %1071 = vmatprep.mubr.f32.mxu0 %v3050_v22 }
 0x44c   :  { %1109 = vmatpush1.msra.mxu1 %v3051_v23  ;;  %1142 = vmatprep.mubr.f32.mxu1 %v3050_v22  ;;  %v828_v23 = vrot.slane %v2240_v1, 4 }
 0x44d   :  { %1181 = vmatprep.subr.mxu0 %v2473_v24  ;;  %1252 = vmatprep.subr.mxu1 %v2476_v25  ;;  %v827_v24 = vrot.slane %v2242_v51, 4 }
 0x4ec   :  { %v899_v18 = vpop.f32.mrf.mxu0  ;;  %v970_v12 = vpop.f32.mrf.mxu1 }
 0x4ed   :  { %v900_v20 = vadd.f32 %v899_v18, %v825_v14  ;;  %v971_v26 = vadd.f32 %v970_v12, %v827_v24  ;;  %v3072_v12 = vld [vmem:[#allocation20_spill] sm:$0xff] }
 0x4ee   :  { %v901_v10 = vpop.f32.mrf.mxu0  ;;  %v972_v22 = vpop.f32.mrf.mxu1 }
 0x4ef   :  { %v1606_v63 = vmul.f32 -1.442695, %v900_v20  ;;  %v902_v9 = vadd.f32 %v901_v10, %v826_v16  ;;  %v973_v59 = vadd.f32 %v972_v22, %v828_v23  ;;  %v3073_v20 = vld [vmem:[#allocation27_spill] sm:$0xff]  ;;  %v3074_v23 = vld [vmem:[#allocation21_spill] sm:$0xff] }
 0x4f1   :  { %1690 = vpow2.f32 %v1606_v63  ;;  %v1607_v52 = vmul.f32 -1.442695, %v902_v9  ;;  %v1608_v25 = vmul.f32 -1.442695, %v973_v59 }
 0x4f3   :  { %1692 = vpow2.f32 %v1607_v52 }
 0x4f4   :  { %1694 = vpow2.f32 %v1608_v25 }
 0x4fe   :  { %v1691_v41 = vpop.eup %1690 }
 0x4ff   :  { %v978_v58 = vadd.f32 1.0, %v1691_v41  ;;  %v3071_v41 = vld [vmem:[#allocation25_spill] sm:$0xff] }
 0x500   :  { %v1693_v28 = vpop.eup %1692 }
 0x501   :  { %1696 = vrcp.f32 %v978_v58  ;;  %v984_v14 = vadd.f32 1.0, %v1693_v28  ;;  %v1695_v63 = vpop.eup %1694  ;;  %v3070_v58 = vld [vmem:[#allocation19_spill] sm:$0xff]  ;;  %v2726_v28 = vld [vmem:[#allocation9 + $0x70] sm:$0xff] }
 0x502   :  { %1698 = vtanh.f32 %v971_v26  ;;  %v991_v16 = vadd.f32 1.0, %v1695_v63  ;;  %v3075_v26 = vld [vmem:[#allocation29_spill] sm:$0xff]  ;;  %3076 = vst [vmem:[#allocation26_spill] sm:$0xff] %v2726_v28  ;;  %v2730_v63 = vld [vmem:[#allocation9 + $0x58] sm:$0xff] }
 0x503   :  { %1700 = vrcp.f32 %v984_v14  ;;  %v3077_v14 = vld [vmem:[#allocation22_spill] sm:$0xff]  ;;  %3078 = vst [vmem:[#allocation35_spill] sm:$0xff] %v2730_v63 }
 0x504   :  { %1702 = vrcp.f32 %v991_v16  ;;  %v2738_v16 = vld [vmem:[#allocation9 + $0x38] sm:$0xff] }
 0x505   :  { %3082 = vst [vmem:[#allocation36_spill] sm:$0xff] %v2738_v16 }
 0x50e   :  { %v1697_v10 = vpop.eup %1696 }
 0x50f   :  { %v1699_v9 = vpop.eup %1698 }
 0x510   :  { %v1701_v52 = vpop.eup %1700  ;;  %v995_v1 = vmul.f32 %v1699_v9, %v1697_v10  ;;  %v3079_v10 = vld [vmem:[#allocation31_spill] sm:$0xff]  ;;  %v2734_v9 = vld [vmem:[#allocation9 + $0x50] sm:$0xff] }
 0x511   :  { %v994_v22 = vmul.f32 %v1701_v52, %v2484_v43  ;;  %v1703_v51 = vpop.eup %1702  ;;  %3080 = vst [vmem:[#allocation28_spill] sm:$0xff] %v2734_v9  ;;  %v3081_v52 = vld [vmem:[#allocation23_spill] sm:$0xff] }
 0x513   :  { %v2671_v18 = vadd.f32 %v995_v1, %v994_v22  ;;  %v3083_v1 = vld [vmem:[#allocation33_spill] sm:$0xff] }
 0x514   :  { %v2742_v22 = vld [vmem:[#allocation9 + $0x30] sm:$0xff] }
 0x515   :  { %1704 = vtanh.f32 %v2671_v18  ;;  %3084 = vst [vmem:[#allocation30_spill] sm:$0xff] %v2742_v22 }
 0x522   :  { %v1705_v24 = vpop.eup %1704 }
 0x523   :  { %v998_v25 = vmul.f32 %v1705_v24, %v1703_v51  ;;  %v3085_v51 = vld [vmem:[#allocation24_spill] sm:$0xff]  ;;  %v2746_v24 = vld [vmem:[#allocation9 + $0x18] sm:$0xff] }
 0x524   :  { %3086 = vst [vmem:[#allocation37_spill] sm:$0xff] %v2746_v24 }
 0x525   :  { %1072 = vmatmul.mubr.f32.vlgmr.msra.gmra.mxu0 %v998_v25  ;;  %v1531_v59 = vrot.slane %v998_v25, 4  ;;  %1143 = vmatmul.mubr.f32.vlgmr.msra.gmra.mxu1 %v998_v25  ;;  %v3087_v25 = vld [vmem:[#allocation34_spill] sm:$0xff] }
 0x526   :  { %1182 = vmatpush1.msra.mxu0 %v2487_v55  ;;  %1253 = vmatpush1.msra.mxu1 %v2490_v49 }
 0x527   :  { %1183 = vmatprep.subr.mxu0 %v2493_v57  ;;  %1254 = vmatprep.subr.mxu1 %v2496_v61  ;;  %v2679_v43 = vsel %vm1548_vm3, %v2500_v62, %v1531_v59  ;;  %v3069_v62 = vld [vmem:[#allocation41_spill] sm:$0xff]  ;;  %v3088_v59 = vmov 0.0  }
 0x528   :  { %1184 = vmatpush1.msra.mxu0 %v2502_v2  ;;  %1255 = vmatpush1.msra.mxu1 %v2505_v3 }
 0x529   :  { %1185 = vmatprep.subr.mxu0 %v2508_v4  ;;  %1256 = vmatprep.subr.mxu1 %v2511_v5 }
 0x52a   :  { %1186 = vmatpush1.msra.mxu0 %v2514_v6  ;;  %1257 = vmatpush1.msra.mxu1 %v2517_v60 }
 0x52b   :  { %1187 = vmatprep.subr.mxu0 %v2520_v7  ;;  %1258 = vmatprep.subr.mxu1 %v2523_v8 }
 0x52c   :  { %1188 = vmatpush1.msra.mxu0 %v2526_v11  ;;  %1259 = vmatpush1.msra.mxu1 %v2529_v13 }
 0x52d   :  { %1189 = vmatprep.subr.mxu0 %v2532_v15  ;;  %1260 = vmatprep.subr.mxu1 %v2535_v17 }
 0x52e   :  { %1190 = vmatpush1.msra.mxu0 %v2538_v19  ;;  %1261 = vmatpush1.msra.mxu1 %v2541_v21 }
 0x52f   :  { %1191 = vmatprep.subr.mxu0 %v2544_v27  ;;  %1262 = vmatprep.subr.mxu1 %v2547_v29 }
 0x530   :  { %1192 = vmatpush1.msra.mxu0 %v2550_v30  ;;  %1263 = vmatpush1.msra.mxu1 %v2553_v31 }
 0x531   :  { %1193 = vmatprep.subr.mxu0 %v2556_v32  ;;  %1264 = vmatprep.subr.mxu1 %v2559_v33 }
 0x532   :  { %1194 = vmatpush1.msra.mxu0 %v2562_v35  ;;  %1265 = vmatpush1.msra.mxu1 %v2565_v36 }
 0x533   :  { %1195 = vmatprep.subr.mxu0 %v2568_v37  ;;  %1266 = vmatprep.subr.mxu1 %v2571_v38 }
 0x534   :  { %1196 = vmatpush1.msra.mxu0 %v2574_v39  ;;  %1267 = vmatpush1.msra.mxu1 %v2577_v40 }
 0x535   :  { %1197 = vmatprep.subr.mxu0 %v2580_v42  ;;  %1268 = vmatprep.subr.mxu1 %v2583_v44 }
 0x536   :  { %1198 = vmatpush1.msra.mxu0 %v2586_v46  ;;  %1269 = vmatpush1.msra.mxu1 %v2589_v48 }
 0x537   :  { %1199 = vmatprep.subr.mxu0 %v2592_v50  ;;  %1270 = vmatprep.subr.mxu1 %v2595_v45 }
 0x538   :  { %1200 = vmatpush1.msra.mxu0 %v2598_v56  ;;  %1271 = vmatpush1.msra.mxu1 %v2601_v54 }
 0x539   :  { %1201 = vmatprep.subr.mxu0 %v2604_v0  ;;  %1272 = vmatprep.subr.mxu1 %v2607_v53 }
 0x53a   :  { %1202 = vmatpush1.msra.mxu0 %v2610_v47  ;;  %1273 = vmatpush1.msra.mxu1 %v2613_v34 }
 0x53b   :  { %1203 = vmatprep.subr.mxu0 %v3069_v62  ;;  %1274 = vmatprep.subr.mxu1 %v3070_v58 }
 0x53c   :  { %1204 = vmatpush1.msra.mxu0 %v3071_v41  ;;  %1275 = vmatpush1.msra.mxu1 %v3072_v12 }
 0x53d   :  { %1205 = vmatprep.subr.mxu0 %v3073_v20  ;;  %1276 = vmatprep.subr.mxu1 %v3074_v23 }
 0x53e   :  { %1206 = vmatpush1.msra.mxu0 %v3075_v26  ;;  %1277 = vmatpush1.msra.mxu1 %v2726_v28 }
 0x53f   :  { %1207 = vmatprep.subr.mxu0 %v3077_v14  ;;  %1278 = vmatprep.subr.mxu1 %v2730_v63 }
 0x540   :  { %1208 = vmatpush1.msra.mxu0 %v3079_v10  ;;  %1279 = vmatpush1.msra.mxu1 %v2734_v9  ;;  %v2760_v9 = vld [vmem:[#allocation4 + $0x8] sm:$0xff] }
 0x541   :  { %1209 = vmatprep.subr.mxu0 %v3081_v52  ;;  %1280 = vmatprep.subr.mxu1 %v2738_v16  ;;  %v2751_v52 = vld [vmem:[#allocation9 + $0x10] sm:$0xff]  ;;  %3093 = vst [vmem:[#allocation39_spill] sm:$0xff] %v2760_v9 }
 0x542   :  { %1210 = vmatpush1.msra.mxu0 %v3083_v1  ;;  %1281 = vmatpush1.msra.mxu1 %v2742_v22  ;;  %3089 = vst [vmem:[#allocation32_spill] sm:$0xff] %v2751_v52  ;;  %v3090_v1 = vld [vmem:[#allocation17_spill] sm:$0xff]  ;;  %v3091_v16 = vld [vmem:[#allocation18_spill] sm:$0xff]  ;;  %v2757_v22 = vld [vmem:[#allocation4] sm:$0xff] }
 0x543   :  { %1211 = vmatprep.subr.mxu0 %v3085_v51  ;;  %1282 = vmatprep.subr.mxu1 %v2746_v24  ;;  %3092 = vst [vmem:[#allocation38_spill] sm:$0xff] %v2757_v22  ;;  %v999_v51 = vrot.slane %v2757_v22, 5  ;;  %v2766_v22 = vld [vmem:[#allocation4 + $0x10] sm:$0xff] }
 0x544   :  { %1212 = vmatpush1.msra.mxu0 %v3087_v25  ;;  %1245 = vmatprep.mubr.f32.mxu0 %v3088_v59  ;;  %v1000_v25 = vrot.slane %v2760_v9, 5  ;;  %v1001_v20 = vrot.slane %v2766_v22, 5 }
 0x545   :  { %1283 = vmatpush1.msra.mxu1 %v2751_v52  ;;  %1316 = vmatprep.mubr.f32.mxu1 %v3088_v59 }
 0x546   :  { %1355 = vmatprep.subr.mxu0 %v3090_v1  ;;  %1426 = vmatprep.subr.mxu1 %v3091_v16  ;;  %v2763_v1 = vld [vmem:[#allocation4 + $0x18] sm:$0xff] }
 0x547   :  { %3094 = vst [vmem:[#allocation40_spill] sm:$0xff] %v2763_v1  ;;  %v1002_v16 = vrot.slane %v2763_v1, 5 }
 0x5e5   :  { %v1073_v24 = vpop.f32.mrf.mxu0  ;;  %v1144_v52 = vpop.f32.mrf.mxu1 }
 0x5e6   :  { %v1074_v10 = vadd.f32 %v1073_v24, %v999_v51  ;;  %v1145_v51 = vadd.f32 %v1144_v52, %v1001_v20 }
 0x5e7   :  { %v1075_v63 = vpop.f32.mrf.mxu0  ;;  %v1146_v26 = vpop.f32.mrf.mxu1 }
 0x5e8   :  { %v1609_v14 = vmul.f32 -1.442695, %v1074_v10  ;;  %v1076_v28 = vadd.f32 %v1075_v63, %v1000_v25  ;;  %v1147_v23 = vadd.f32 %v1146_v26, %v1002_v16 }
 0x5ea   :  { %1706 = vpow2.f32 %v1609_v14  ;;  %v1610_v59 = vmul.f32 -1.442695, %v1076_v28  ;;  %v1611_v9 = vmul.f32 -1.442695, %v1147_v23 }
 0x5ec   :  { %1708 = vpow2.f32 %v1610_v59 }
 0x5ed   :  { %1710 = vpow2.f32 %v1611_v9 }
 0x5f7   :  { %v1707_v12 = vpop.eup %1706 }
 0x5f8   :  { %v1152_v24 = vadd.f32 1.0, %v1707_v12 }
 0x5f9   :  { %v1709_v10 = vpop.eup %1708 }
 0x5fa   :  { %1712 = vrcp.f32 %v1152_v24  ;;  %v1158_v14 = vadd.f32 1.0, %v1709_v10  ;;  %v1711_v28 = vpop.eup %1710 }
 0x5fb   :  { %1714 = vtanh.f32 %v1145_v51  ;;  %v1165_v1 = vadd.f32 1.0, %v1711_v28 }
 0x5fc   :  { %1716 = vrcp.f32 %v1158_v14 }
 0x5fd   :  { %1718 = vrcp.f32 %v1165_v1 }
 0x607   :  { %v1713_v63 = vpop.eup %1712 }
 0x608   :  { %v1715_v25 = vpop.eup %1714 }
 0x609   :  { %v1717_v59 = vpop.eup %1716  ;;  %v1169_v26 = vmul.f32 %v1715_v25, %v1713_v63 }
 0x60a   :  { %v1168_v16 = vmul.f32 %v1717_v59, %v2671_v18  ;;  %v1719_v12 = vpop.eup %1718 }
 0x60c   :  { %v2770_v41 = vadd.f32 %v1169_v26, %v1168_v16 }
 0x60e   :  { %1720 = vtanh.f32 %v2770_v41 }
 0x61b   :  { %v1721_v20 = vpop.eup %1720 }
 0x61c   :  { %v1172_v23 = vmul.f32 %v1721_v20, %v1719_v12 }
 0x61e   :  { %1246 = vmatmul.mubr.f32.vlgmr.msra.gmra.mxu0 %v1172_v23  ;;  %1317 = vmatmul.mubr.f32.vlgmr.msra.gmra.mxu1 %v1172_v23  ;;  %v1534_v9 = vrot.slane %v1172_v23, 3 }
 0x61f   :  { %1356 = vmatpush1.msra.mxu0 %v2487_v55  ;;  %1427 = vmatpush1.msra.mxu1 %v2490_v49  ;;  %v3095_v55 = vld [vmem:[#allocation25_spill] sm:$0xff]  ;;  %v3096_v49 = vld [vmem:[#allocation20_spill] sm:$0xff] }
 0x620   :  { %1357 = vmatprep.subr.mxu0 %v2493_v57  ;;  %1428 = vmatprep.subr.mxu1 %v2496_v61  ;;  %v2778_v18 = vsel %vm1550_vm4, %v2679_v43, %v1534_v9  ;;  %v3097_v57 = vld [vmem:[#allocation27_spill] sm:$0xff]  ;;  %v3098_v61 = vld [vmem:[#allocation21_spill] sm:$0xff] }
 0x621   :  { %1358 = vmatpush1.msra.mxu0 %v2502_v2  ;;  %1429 = vmatpush1.msra.mxu1 %v2505_v3  ;;  %v3099_v2 = vld [vmem:[#allocation29_spill] sm:$0xff]  ;;  %v3100_v3 = vld [vmem:[#allocation26_spill] sm:$0xff] }
 0x622   :  { %1359 = vmatprep.subr.mxu0 %v2508_v4  ;;  %1430 = vmatprep.subr.mxu1 %v2511_v5  ;;  %v3101_v4 = vld [vmem:[#allocation22_spill] sm:$0xff]  ;;  %v3102_v5 = vld [vmem:[#allocation35_spill] sm:$0xff] }
 0x623   :  { %1360 = vmatpush1.msra.mxu0 %v2514_v6  ;;  %1431 = vmatpush1.msra.mxu1 %v2517_v60  ;;  %v3103_v6 = vld [vmem:[#allocation31_spill] sm:$0xff]  ;;  %v3104_v60 = vld [vmem:[#allocation28_spill] sm:$0xff] }
 0x624   :  { %1361 = vmatprep.subr.mxu0 %v2520_v7  ;;  %1432 = vmatprep.subr.mxu1 %v2523_v8  ;;  %v3105_v7 = vld [vmem:[#allocation23_spill] sm:$0xff]  ;;  %v3106_v8 = vld [vmem:[#allocation36_spill] sm:$0xff] }
 0x625   :  { %1362 = vmatpush1.msra.mxu0 %v2526_v11  ;;  %1433 = vmatpush1.msra.mxu1 %v2529_v13  ;;  %v3107_v11 = vld [vmem:[#allocation33_spill] sm:$0xff]  ;;  %v3108_v13 = vld [vmem:[#allocation30_spill] sm:$0xff] }
 0x626   :  { %1363 = vmatprep.subr.mxu0 %v2532_v15  ;;  %1434 = vmatprep.subr.mxu1 %v2535_v17  ;;  %v3109_v15 = vld [vmem:[#allocation24_spill] sm:$0xff]  ;;  %v3110_v17 = vld [vmem:[#allocation37_spill] sm:$0xff] }
 0x627   :  { %1364 = vmatpush1.msra.mxu0 %v2538_v19  ;;  %1435 = vmatpush1.msra.mxu1 %v2541_v21  ;;  %v3111_v19 = vld [vmem:[#allocation34_spill] sm:$0xff]  ;;  %v3112_v21 = vmov 0.0  }
 0x628   :  { %1365 = vmatprep.subr.mxu0 %v2544_v27  ;;  %1436 = vmatprep.subr.mxu1 %v2547_v29  ;;  %v3113_v27 = vld [vmem:[#allocation32_spill] sm:$0xff]  ;;  %v3114_v29 = vld [vmem:[#allocation38_spill] sm:$0xff] }
 0x629   :  { %1366 = vmatpush1.msra.mxu0 %v2550_v30  ;;  %1437 = vmatpush1.msra.mxu1 %v2553_v31  ;;  %v1173_v30 = vrot.slane %v3114_v29, 6  ;;  %v3115_v31 = vld [vmem:[#allocation39_spill] sm:$0xff]  ;;  %v1347_v59 = vrot.slane %v3114_v29, 7 }
 0x62a   :  { %1367 = vmatprep.subr.mxu0 %v2556_v32  ;;  %1438 = vmatprep.subr.mxu1 %v2559_v33  ;;  %v1174_v32 = vrot.slane %v3115_v31, 6  ;;  %v1348_v26 = vrot.slane %v3115_v31, 7 }
 0x62b   :  { %1368 = vmatpush1.msra.mxu0 %v2562_v35  ;;  %1439 = vmatpush1.msra.mxu1 %v2565_v36 }
 0x62c   :  { %1369 = vmatprep.subr.mxu0 %v2568_v37  ;;  %1440 = vmatprep.subr.mxu1 %v2571_v38 }
 0x62d   :  { %1370 = vmatpush1.msra.mxu0 %v2574_v39  ;;  %1441 = vmatpush1.msra.mxu1 %v2577_v40 }
 0x62e   :  { %1371 = vmatprep.subr.mxu0 %v2580_v42  ;;  %1442 = vmatprep.subr.mxu1 %v2583_v44  ;;  %v3116_v42 = vld [vmem:[#allocation40_spill] sm:$0xff] }
 0x62f   :  { %1372 = vmatpush1.msra.mxu0 %v2586_v46  ;;  %1443 = vmatpush1.msra.mxu1 %v2589_v48  ;;  %v1176_v44 = vrot.slane %v3116_v42, 6 }
 0x630   :  { %1373 = vmatprep.subr.mxu0 %v2592_v50  ;;  %1444 = vmatprep.subr.mxu1 %v2595_v45  ;;  %v1175_v50 = vrot.slane %v2766_v22, 6 }
 0x631   :  { %1374 = vmatpush1.msra.mxu0 %v2598_v56  ;;  %1445 = vmatpush1.msra.mxu1 %v2601_v54 }
 0x632   :  { %1375 = vmatprep.subr.mxu0 %v2604_v0  ;;  %1446 = vmatprep.subr.mxu1 %v2607_v53 }
 0x633   :  { %1376 = vmatpush1.msra.mxu0 %v2610_v47  ;;  %1447 = vmatpush1.msra.mxu1 %v2613_v34 }
 0x634   :  { %1377 = vmatprep.subr.mxu0 %v3069_v62  ;;  %1448 = vmatprep.subr.mxu1 %v3070_v58 }
 0x635   :  { %1378 = vmatpush1.msra.mxu0 %v3095_v55  ;;  %1449 = vmatpush1.msra.mxu1 %v3096_v49  ;;  %v1350_v49 = vrot.slane %v3116_v42, 7 }
 0x636   :  { %1379 = vmatprep.subr.mxu0 %v3097_v57  ;;  %1450 = vmatprep.subr.mxu1 %v3098_v61 }
 0x637   :  { %1380 = vmatpush1.msra.mxu0 %v3099_v2  ;;  %1451 = vmatpush1.msra.mxu1 %v3100_v3  ;;  %v1349_v2 = vrot.slane %v2766_v22, 7 }
 0x638   :  { %1381 = vmatprep.subr.mxu0 %v3101_v4  ;;  %1452 = vmatprep.subr.mxu1 %v3102_v5 }
 0x639   :  { %1382 = vmatpush1.msra.mxu0 %v3103_v6  ;;  %1453 = vmatpush1.msra.mxu1 %v3104_v60 }
 0x63a   :  { %1383 = vmatprep.subr.mxu0 %v3105_v7  ;;  %1454 = vmatprep.subr.mxu1 %v3106_v8 }
 0x63b   :  { %1384 = vmatpush1.msra.mxu0 %v3107_v11  ;;  %1455 = vmatpush1.msra.mxu1 %v3108_v13 }
 0x63c   :  { %1385 = vmatprep.subr.mxu0 %v3109_v15  ;;  %1456 = vmatprep.subr.mxu1 %v3110_v17 }
 0x63d   :  { %1386 = vmatpush1.msra.mxu0 %v3111_v19  ;;  %1419 = vmatprep.mubr.f32.mxu0 %v3112_v21 }
 0x63e   :  { %1457 = vmatpush1.msra.mxu1 %v3113_v27  ;;  %1490 = vmatprep.mubr.f32.mxu1 %v3112_v21 }
 0x6de   :  { %v1247_v33 = vpop.f32.mrf.mxu0  ;;  %v1318_v39 = vpop.f32.mrf.mxu1 }
 0x6df   :  { %v1248_v35 = vadd.f32 %v1247_v33, %v1173_v30  ;;  %v1319_v54 = vadd.f32 %v1318_v39, %v1175_v50 }
 0x6e0   :  { %v1249_v36 = vpop.f32.mrf.mxu0  ;;  %v1320_v46 = vpop.f32.mrf.mxu1 }
 0x6e1   :  { %v1612_v37 = vmul.f32 -1.442695, %v1248_v35  ;;  %v1250_v38 = vadd.f32 %v1249_v36, %v1174_v32  ;;  %v1321_v48 = vadd.f32 %v1320_v46, %v1176_v44 }
 0x6e3   :  { %1722 = vpow2.f32 %v1612_v37  ;;  %v1613_v40 = vmul.f32 -1.442695, %v1250_v38  ;;  %v1614_v45 = vmul.f32 -1.442695, %v1321_v48 }
 0x6e5   :  { %1724 = vpow2.f32 %v1613_v40 }
 0x6e6   :  { %1726 = vpow2.f32 %v1614_v45 }
 0x6f0   :  { %v1723_v56 = vpop.eup %1722 }
 0x6f1   :  { %v1326_v0 = vadd.f32 1.0, %v1723_v56 }
 0x6f2   :  { %v1725_v53 = vpop.eup %1724 }
 0x6f3   :  { %1728 = vrcp.f32 %v1326_v0  ;;  %v1332_v47 = vadd.f32 1.0, %v1725_v53  ;;  %v1727_v34 = vpop.eup %1726 }
 0x6f4   :  { %1730 = vtanh.f32 %v1319_v54  ;;  %v1339_v52 = vadd.f32 1.0, %v1727_v34 }
 0x6f5   :  { %1732 = vrcp.f32 %v1332_v47 }
 0x6f6   :  { %1734 = vrcp.f32 %v1339_v52 }
 0x700   :  { %v1729_v43 = vpop.eup %1728 }
 0x701   :  { %v1731_v62 = vpop.eup %1730 }
 0x702   :  { %v1733_v58 = vpop.eup %1732  ;;  %v1343_v1 = vmul.f32 %v1731_v62, %v1729_v43 }
 0x703   :  { %v1342_v51 = vmul.f32 %v1733_v58, %v2770_v41  ;;  %v1735_v10 = vpop.eup %1734 }
 0x705   :  { %v1344_v24 = vadd.f32 %v1343_v1, %v1342_v51 }
 0x707   :  { %1736 = vtanh.f32 %v1344_v24 }
 0x714   :  { %v1737_v14 = vpop.eup %1736 }
 0x715   :  { %v1346_v28 = vmul.f32 %v1737_v14, %v1735_v10 }
 0x717   :  { %1420 = vmatmul.mubr.f32.vlgmr.msra.gmra.mxu0 %v1346_v28  ;;  %1491 = vmatmul.mubr.f32.vlgmr.msra.gmra.mxu1 %v1346_v28  ;;  %v1537_v63 = vrot.slane %v1346_v28, 2 }
 0x719   :  { %v1553_v25 = vsel %vm1552_vm5, %v2778_v18, %v1537_v63 }
 0x7d7   :  { %v1421_v16 = vpop.f32.mrf.mxu0  ;;  %v1492_v9 = vpop.f32.mrf.mxu1 }
 0x7d8   :  { %v1422_v12 = vadd.f32 %v1421_v16, %v1347_v59  ;;  %v1493_v4 = vadd.f32 %v1492_v9, %v1349_v2 }
 0x7d9   :  { %v1423_v20 = vpop.f32.mrf.mxu0  ;;  %v1494_v57 = vpop.f32.mrf.mxu1 }
 0x7da   :  { %v1615_v41 = vmul.f32 -1.442695, %v1422_v12  ;;  %v1424_v23 = vadd.f32 %v1423_v20, %v1348_v26  ;;  %v1495_v61 = vadd.f32 %v1494_v57, %v1350_v49 }
 0x7dc   :  { %1738 = vpow2.f32 %v1615_v41  ;;  %v1616_v55 = vmul.f32 -1.442695, %v1424_v23  ;;  %v1617_v18 = vmul.f32 -1.442695, %v1495_v61 }
 0x7de   :  { %1740 = vpow2.f32 %v1616_v55 }
 0x7df   :  { %1742 = vpow2.f32 %v1617_v18 }
 0x7e9   :  { %v1739_v3 = vpop.eup %1738 }
 0x7ea   :  { %v1500_v5 = vadd.f32 1.0, %v1739_v3 }
 0x7eb   :  { %v1741_v6 = vpop.eup %1740 }
 0x7ec   :  { %1744 = vrcp.f32 %v1500_v5  ;;  %v1506_v60 = vadd.f32 1.0, %v1741_v6  ;;  %v1743_v7 = vpop.eup %1742 }
 0x7ed   :  { %1746 = vtanh.f32 %v1493_v4  ;;  %v1513_v15 = vadd.f32 1.0, %v1743_v7 }
 0x7ee   :  { %1748 = vrcp.f32 %v1506_v60 }
 0x7ef   :  { %1750 = vrcp.f32 %v1513_v15 }
 0x7f9   :  { %v1745_v8 = vpop.eup %1744 }
 0x7fa   :  { %v1747_v11 = vpop.eup %1746 }
 0x7fb   :  { %v1749_v13 = vpop.eup %1748  ;;  %v1517_v17 = vmul.f32 %v1747_v11, %v1745_v8 }
 0x7fc   :  { %v1516_v19 = vmul.f32 %v1749_v13, %v1344_v24 }
 0x7fe   :  { %v1518_v21 = vadd.f32 %v1517_v17, %v1516_v19 }
 0x800   :  { %1558 = vst [vmem:[#allocation3] sm:$0x1] %v1518_v21  ;;  %1752 = vtanh.f32 %v1518_v21 }
 0x807   :  { %v1562_v22 = vld [vmem:[#allocation3] sm:$0x1] }
 0x808   :  { %1563 = vst [vmem:[#allocation11] sm:$0x1] %v1562_v22 }
 0x809   :  { %1893 = shalt.err (!%p1890_p5)
}
 0x80a   :  { %1583 = dma.vmem_to_hbm [thread:$0]  %s1581_s2, 16, %s2860_s4, [#allocation12]   ;;  %v1751_v27 = vpop.eup %1750  ;;  %vm1554_vm6 = vcmask 1046528  }
 0x80b   :  { %s1937_s9 = smov [#allocation10]  }
 0x80c   :  { %s1570_s10 = sshll.u32 %s1937_s9, 4  ;;  %s1571_s10 = int_to_ptr.vmem [resolvable:$true] %s1570_s10 }
 0x80d   :  { %v1753_v29 = vpop.eup %1752  ;;  %s1902_s11 = scalar_lea.vmem %s1571_s10, 128  ;;  %p1907_p7 = scmp.lt.s32.totalorder %s1571_s10, %s1571_s10 }
 0x80e   :  { %v1520_v30 = vmul.f32 %v1753_v29, %v1751_v27  ;;  %p1903_p6 = scmp.ne.s32.totalorder %s1571_s10, %s1902_s11  ;;  %p1908_p8 = scmp.lt.s32.totalorder %s1902_s11, %s1902_s11 }
 0x810   :  { %v1540_v31 = vrot.slane %v1520_v30, 1  ;;  %1557 = vst [vmem:[#allocation2] sm:$0x1] %v1520_v30  ;;  %p1909_p9 = por %p1908_p8, %p1907_p7 }
 0x812   :  { %v1555_v32 = vsel %vm1554_vm6, %v1553_v25, %v1540_v31  ;;  %p1910_p10 = pnand %p1909_p9, %p1903_p6 }
 0x813   :  { %1556 = vst [vmem:[#allocation10] sm:$0xff] %v1555_v32 }
 0x814   :  { %1913 = shalt.err (!%p1910_p10)
}
 0x815   :  { %1573 = dma.vmem_to_hbm [thread:$0]  %s1571_s10, 128, %s2859_s3, [#allocation6]  }
 0x816   :  { %1926 = dma.done.wait [#allocation6], 128  }
 0x817   :  { %1927 = vsyncadd [#allocation6], 4294967168 }
 0x818   :  { %1928 = dma.done.wait [#allocation12], 16  }
 0x819   :  { %1929 = vsyncadd [#allocation12], 4294967280 }
 0x81a   :  { %1590 = vsyncpa [#allocation5], 1 }
 0x81b   :  { %1591 = vsyncpa [#allocation8], 1 }
 0x81c   :  { %1592 = vsyncpa [#allocation6], 1 }
 0x81d   :  { %1593 = vsyncpa [#allocation12], 1 }

</bundles_post_ra>
